<compile_context>
chip_gen: v5e
topology: v5e:2x2
jax: 0.10.0
libtpu: 0.0.40
codegen_flags: <defaults>
</compile_context>

<pallas_src>
import functools

import numpy as np
import jax
import jax.numpy as jnp
from jax.experimental import pallas as pl
from jax.experimental.pallas import tpu as pltpu

# Keep f32 accuracy locally on the in-kernel dots (not a global config).
# TODO(synk): relax to default / bf16 operands on v6e/v7x once the surrounding
# model's accuracy budget allows (each f32 HIGHEST matmul = 6 bf16 MXU passes).
_DOT_PRECISION = jax.lax.Precision.HIGHEST


# ---------------------------------------------------------------------------
# Exact GELU (PyTorch nn.GELU() default, approximate='none').
# TODO(synk): lax.erf has no guaranteed Mosaic lowering; erf is evaluated with
# the Abramowitz–Stegun 7.1.26 polynomial (max abs error ~1.5e-7).
def _erf(z):
    a1, a2, a3, a4, a5 = (0.254829592, -0.284496736, 1.421413741,
                          -1.453152027, 1.061405429)
    p = 0.3275911
    az = jnp.abs(z)
    t = 1.0 / (1.0 + p * az)
    poly = ((((a5 * t + a4) * t + a3) * t + a2) * t + a1) * t
    r = 1.0 - poly * jnp.exp(-az * az)
    return jnp.where(z < 0.0, -r, r)


def _gelu_exact(v):
    return 0.5 * v * (1.0 + _erf(v * 0.7071067811865476))


# ---------------------------------------------------------------------------
# Pallas kernel: one batch element per grid step; everything channel-batched.
def _fourier_block_kernel(x_ref, fr_ref, fi_ref, g_ref, w1_ref, w2_ref,
                          cw_ref, cb_ref, out_ref):
    c_in = x_ref.shape[1]
    dot = functools.partial(jnp.dot, preferred_element_type=jnp.float32,
                            precision=_DOT_PRECISION)

    x = x_ref[0]                          # (C_in, H*W), lane-dense

    # ---- forward truncated rfft2 (all channels in one matmul each);
    #      real/imag spectra are lane-tiled twice: [Re | Re], [Im | Im].
    xrr = dot(x, fr_ref[...])             # (C_in, 2F)
    xii = dot(x, fi_ref[...])             # (C_in, 2F)

    # ---- spectral complex channel mixing: einsum('bixy,ioxy->boxy') on the
    #      kept modes, as C_in broadcast-FMAs over lane-dense (C_out, 2F) tiles.
    #      o_cat = [Re(out_ft) | Im(out_ft)].
    # TODO(synk): for large C_in turn this into a per-mode batched contraction.
    o_cat = xrr[0:1, :] * w1_ref[0] + xii[0:1, :] * w2_ref[0]
    for i in range(1, c_in):
        o_cat = o_cat + xrr[i:i + 1, :] * w1_ref[i] + xii[i:i + 1, :] * w2_ref[i]

    # ---- inverse transform (irfft2 of the zero-padded spectrum): one matmul,
    #      real+imag folded via the concatenated G matrix.
    x1 = dot(o_cat, g_ref[...])           # (C_out, H*W)

    # ---- 1x1 convolution on the MXU + bias (lane-broadcast from (C_out, 1)).
    x2 = dot(cw_ref[...], x) + cb_ref[...]        # (C_out, H*W)

    # ---- activation + residual, lane-dense store.
    out_ref[0] = x + _gelu_exact(x1 + x2)


# ---------------------------------------------------------------------------
# Precomputed truncated-DFT matrices (numpy, done once in the wrapper).
def _spectral_matrices(H, W, m1, m2):
    mlist = np.concatenate([np.arange(m1), np.arange(H - m1, H)]).astype(np.float64)
    kk = np.arange(m2, dtype=np.float64)
    hh = np.arange(H, dtype=np.float64)
    ww = np.arange(W, dtype=np.float64)

    # ang[(mi, k), (h, w)] = 2*pi*(m*h/H + k*w/W), flattened to (F, H*W)
    ang = 2.0 * np.pi * (mlist[:, None, None, None] * hh[None, None, :, None] / H
                         + kk[None, :, None, None] * ww[None, None, None, :] / W)
    M = mlist.shape[0]
    F = M * m2
    HW = H * W

    fr = np.cos(ang).reshape(F, HW)               # forward, real part
    fi = (-np.sin(ang)).reshape(F, HW)            # forward, imag part

    # inverse: hermitian 1x/2x weights folded, full complex ifft along H,
    # real-projection irfft along W  ->  y = Re(out_ft) @ GR + Im(out_ft) @ GI
    c = np.where((kk == 0) | ((W % 2 == 0) & (kk == W // 2)), 1.0, 2.0)
    gr = ((c[None, :, None, None] / (H * W)) * np.cos(ang)).reshape(F, HW)
    gi = ((-c[None, :, None, None] / (H * W)) * np.sin(ang)).reshape(F, HW)

    fr2 = np.concatenate([fr.T, fr.T], axis=1)    # (HW, 2F)  -> [Re | Re]
    fi2 = np.concatenate([fi.T, fi.T], axis=1)    # (HW, 2F)  -> [Im | Im]
    gcat = np.concatenate([gr, gi], axis=0)       # (2F, HW)
    return (jnp.asarray(fr2, jnp.float32),
            jnp.asarray(fi2, jnp.float32),
            jnp.asarray(gcat, jnp.float32))


def fourier_basic_block(x, fourier_w1, fourier_w2, conv_w, conv_b):
    """FourierBasicBlock forward (num_dimensions=2, activation='gelu', residual=True).

    x:            (B, C_in, H, W)           float32, NCHW
    fourier_w1/2: (C_in, C_out, m1, m2, 2)  float32  (real/imag stacked last)
    conv_w:       (C_out, C_in)             float32  (1x1 conv weight, squeezed)
    conv_b:       (C_out,)                  float32
    """
    B, C_in, H, W = x.shape
    C_out = conv_w.shape[0]
    m1, m2 = fourier_w1.shape[2], fourier_w1.shape[3]
    assert 2 * m1 <= H and m2 <= W // 2 + 1 and C_in == C_out
    HW = H * W
    F = 2 * m1 * m2           # number of kept complex modes
    F2 = 2 * F

    fr2, fi2, gcat = _spectral_matrices(H, W, m1, m2)

    # Spectral mixing weights, flattened over kept modes and real/imag-folded:
    #   o_cat[o] = sum_i  [Re|Re](x_ft[i]) * w1[i,o]  +  [Im|Im](x_ft[i]) * w2[i,o]
    wr = jnp.concatenate([fourier_w1[..., 0], fourier_w2[..., 0]],
                         axis=2).reshape(C_in, C_out, F)
    wi = jnp.concatenate([fourier_w1[..., 1], fourier_w2[..., 1]],
                         axis=2).reshape(C_in, C_out, F)
    w1 = jnp.concatenate([wr, wi], axis=-1)       # (C_in, C_out, 2F)
    w2 = jnp.concatenate([-wi, wr], axis=-1)      # (C_in, C_out, 2F)

    x_flat = x.reshape(B, C_in, HW)               # lane-dense layout (free reshape)
    cb2 = conv_b.reshape(C_out, 1)

    def full_spec(a):
        nd = a.ndim
        return pl.BlockSpec(a.shape, lambda b, _nd=nd: (0,) * _nd)

    in_specs = [pl.BlockSpec((1, C_in, HW), lambda b: (b, 0, 0)),
                full_spec(fr2), full_spec(fi2), full_spec(gcat),
                full_spec(w1), full_spec(w2),
                full_spec(conv_w), full_spec(cb2)]

    flops_per_b = (2 * 2 * C_in * HW * F2         # forward DFT matmuls
                   + 2 * C_out * F2 * HW          # inverse DFT matmul
                   + 2 * C_out * C_in * HW        # 1x1 conv matmul
                   + 4 * C_in * C_out * F2        # spectral mixing FMAs
                   + 16 * C_out * HW)             # gelu / bias / residual
    weight_bytes = 4 * (fr2.size + fi2.size + gcat.size + w1.size + w2.size
                        + conv_w.size + cb2.size)
    cost = pl.CostEstimate(
        flops=int(B * flops_per_b),
        transcendentals=int(B * C_out * HW),
        bytes_accessed=int(4 * B * (C_in + C_out) * HW + weight_bytes))

    out_flat = pl.pallas_call(
        _fourier_block_kernel,
        out_shape=jax.ShapeDtypeStruct((B, C_out, HW), jnp.float32),
        grid=(B,),
        in_specs=in_specs,
        out_specs=pl.BlockSpec((1, C_out, HW), lambda b: (b, 0, 0)),
        compiler_params=pltpu.CompilerParams(
            dimension_semantics=("parallel",)),
        cost_estimate=cost,
    )(x_flat, fr2, fi2, gcat, w1, w2, conv_w, cb2)

    return out_flat.reshape(B, C_out, H, W)


# ---------------------------------------------------------------------------
# Pure-JAX reference (mirrors the PyTorch forward exactly).
def _reference_forward(x, w1c, w2c, conv_w, conv_b, m1, m2):
    B, C_in, H, W = x.shape
    C_out = conv_w.shape[0]
    hp = jax.lax.Precision.HIGHEST
    x_ft = jnp.fft.rfft2(x)
    out_ft = jnp.zeros((B, C_out, H, W // 2 + 1), dtype=jnp.complex64)
    out_ft = out_ft.at[:, :, :m1, :m2].set(
        jnp.einsum('bixy,ioxy->boxy', x_ft[:, :, :m1, :m2], w1c, precision=hp))
    out_ft = out_ft.at[:, :, -m1:, :m2].set(
        jnp.einsum('bixy,ioxy->boxy', x_ft[:, :, -m1:, :m2], w2c, precision=hp))
    x1 = jnp.fft.irfft2(out_ft, s=(H, W))
    x2 = (jnp.einsum('bihw,oi->bohw', x, conv_w, precision=hp)
          + conv_b[None, :, None, None])
    return x + jax.nn.gelu(x1 + x2, approximate=False)


if __name__ == "__main__":
    B, C, H, W = 2, 4, 16, 16
    m1, m2 = 4, 4

    key = jax.random.PRNGKey(0)
    k_x, k_w1, k_w2, k_cw, k_cb = jax.random.split(key, 5)

    x = jax.random.normal(k_x, (B, C, H, W), dtype=jnp.float32)

    scale = 1.0 / (C * C)
    fourier_w1 = scale * jax.random.uniform(k_w1, (C, C, m1, m2, 2), dtype=jnp.float32)
    fourier_w2 = scale * jax.random.uniform(k_w2, (C, C, m1, m2, 2), dtype=jnp.float32)
    kb = 1.0 / np.sqrt(C)
    conv_w = jax.random.uniform(k_cw, (C, C), jnp.float32, -kb, kb)
    conv_b = jax.random.uniform(k_cb, (C,), jnp.float32, -kb, kb)

    out = fourier_basic_block(x, fourier_w1, fourier_w2, conv_w, conv_b)
    out = jax.block_until_ready(out)

    w1c = fourier_w1[..., 0] + 1j * fourier_w1[..., 1]
    w2c = fourier_w2[..., 0] + 1j * fourier_w2[..., 1]
    ref = _reference_forward(x, w1c, w2c, conv_w, conv_b, m1, m2)
    ref = jax.block_until_ready(ref)

    # tighter than before (1e-3) since the kernel keeps full f32 precision
    if not np.allclose(np.asarray(out), np.asarray(ref), rtol=1e-3, atol=1e-3):
        raise RuntimeError(
            "Pallas kernel mismatch vs reference, max abs err = "
            f"{float(jnp.max(jnp.abs(out - ref)))}")
    print("KERNEL_OK")
</pallas_src>

<mosaic_0001>
module attributes {stable_mosaic.version = 11 : i64} {
  func.func @_fourier_block_kernel(%arg0: i32, %arg1: memref<1x4x256xf32, #tpu.memory_space<vmem>>, %arg2: memref<256x64xf32, #tpu.memory_space<vmem>>, %arg3: memref<256x64xf32, #tpu.memory_space<vmem>>, %arg4: memref<64x256xf32, #tpu.memory_space<vmem>>, %arg5: memref<4x4x64xf32, #tpu.memory_space<vmem>>, %arg6: memref<4x4x64xf32, #tpu.memory_space<vmem>>, %arg7: memref<4x4xf32, #tpu.memory_space<vmem>>, %arg8: memref<4x1xf32, #tpu.memory_space<vmem>>, %arg9: memref<1x4x256xf32, #tpu.memory_space<vmem>>) attributes {dimension_semantics = [#tpu.dimension_semantics<parallel>], iteration_bounds = array<i64: 2>, scalar_prefetch = 0 : i64, scratch_operands = 0 : i64, tpu.core_type = #tpu.core_type<tc>, window_params = [{transform_indices = @transform_0, window_bounds = array<i64: 1, 4, 256>}, {pipeline_mode = #tpu.pipeline_mode<synchronous>, transform_indices = @transform_1, window_bounds = array<i64: 256, 64>}, {pipeline_mode = #tpu.pipeline_mode<synchronous>, transform_indices = @transform_2, window_bounds = array<i64: 256, 64>}, {pipeline_mode = #tpu.pipeline_mode<synchronous>, transform_indices = @transform_3, window_bounds = array<i64: 64, 256>}, {pipeline_mode = #tpu.pipeline_mode<synchronous>, transform_indices = @transform_4, window_bounds = array<i64: 4, 4, 64>}, {pipeline_mode = #tpu.pipeline_mode<synchronous>, transform_indices = @transform_5, window_bounds = array<i64: 4, 4, 64>}, {pipeline_mode = #tpu.pipeline_mode<synchronous>, transform_indices = @transform_6, window_bounds = array<i64: 4, 4>}, {pipeline_mode = #tpu.pipeline_mode<synchronous>, transform_indices = @transform_7, window_bounds = array<i64: 4, 1>}, {transform_indices = @transform_8, window_bounds = array<i64: 1, 4, 256>}]} {
    %c0 = arith.constant 0 : index
    %c0_0 = arith.constant 0 : index
    %c0_1 = arith.constant 0 : index
    %0 = vector.load %arg1[%c0, %c0_0, %c0_1] : memref<1x4x256xf32, #tpu.memory_space<vmem>>, vector<1x4x256xf32>
    %1 = vector.shape_cast %0 : vector<1x4x256xf32> to vector<4x256xf32>
    %c0_2 = arith.constant 0 : index
    %c0_3 = arith.constant 0 : index
    %2 = vector.load %arg2[%c0_2, %c0_3] : memref<256x64xf32, #tpu.memory_space<vmem>>, vector<256x64xf32>
    %cst = arith.constant dense<0.000000e+00> : vector<4x64xf32>
    %3 = tpu.matmul %1, %2, %cst {dimension_numbers = #tpu.dot_dimension_numbers<[1], [0], [0], [1], [0, 0, 1, 1], [], []>, precision = #tpu.contract_precision<fp32>} : vector<4x256xf32>, vector<256x64xf32>, vector<4x64xf32> -> vector<4x64xf32>
    %c0_4 = arith.constant 0 : index
    %c0_5 = arith.constant 0 : index
    %4 = vector.load %arg3[%c0_4, %c0_5] : memref<256x64xf32, #tpu.memory_space<vmem>>, vector<256x64xf32>
    %cst_6 = arith.constant dense<0.000000e+00> : vector<4x64xf32>
    %5 = tpu.matmul %1, %4, %cst_6 {dimension_numbers = #tpu.dot_dimension_numbers<[1], [0], [0], [1], [0, 0, 1, 1], [], []>, precision = #tpu.contract_precision<fp32>} : vector<4x256xf32>, vector<256x64xf32>, vector<4x64xf32> -> vector<4x64xf32>
    %6 = vector.extract_strided_slice %3 {offsets = [0, 0], sizes = [1, 64], strides = [1, 1]} : vector<4x64xf32> to vector<1x64xf32>
    %c0_7 = arith.constant 0 : index
    %c0_8 = arith.constant 0 : index
    %c0_9 = arith.constant 0 : index
    %7 = vector.load %arg5[%c0_7, %c0_8, %c0_9] : memref<4x4x64xf32, #tpu.memory_space<vmem>>, vector<1x4x64xf32>
    %8 = vector.shape_cast %7 : vector<1x4x64xf32> to vector<4x64xf32>
    %9 = vector.broadcast %6 : vector<1x64xf32> to vector<4x64xf32>
    %10 = arith.mulf %9, %8 : vector<4x64xf32>
    %11 = vector.extract_strided_slice %5 {offsets = [0, 0], sizes = [1, 64], strides = [1, 1]} : vector<4x64xf32> to vector<1x64xf32>
    %c0_10 = arith.constant 0 : index
    %c0_11 = arith.constant 0 : index
    %c0_12 = arith.constant 0 : index
    %12 = vector.load %arg6[%c0_10, %c0_11, %c0_12] : memref<4x4x64xf32, #tpu.memory_space<vmem>>, vector<1x4x64xf32>
    %13 = vector.shape_cast %12 : vector<1x4x64xf32> to vector<4x64xf32>
    %14 = vector.broadcast %11 : vector<1x64xf32> to vector<4x64xf32>
    %15 = arith.mulf %14, %13 : vector<4x64xf32>
    %16 = arith.addf %10, %15 : vector<4x64xf32>
    %17 = vector.extract_strided_slice %3 {offsets = [1, 0], sizes = [1, 64], strides = [1, 1]} : vector<4x64xf32> to vector<1x64xf32>
    %c1 = arith.constant 1 : index
    %c0_13 = arith.constant 0 : index
    %c0_14 = arith.constant 0 : index
    %18 = vector.load %arg5[%c1, %c0_13, %c0_14] : memref<4x4x64xf32, #tpu.memory_space<vmem>>, vector<1x4x64xf32>
    %19 = vector.shape_cast %18 : vector<1x4x64xf32> to vector<4x64xf32>
    %20 = vector.broadcast %17 : vector<1x64xf32> to vector<4x64xf32>
    %21 = arith.mulf %20, %19 : vector<4x64xf32>
    %22 = arith.addf %16, %21 : vector<4x64xf32>
    %23 = vector.extract_strided_slice %5 {offsets = [1, 0], sizes = [1, 64], strides = [1, 1]} : vector<4x64xf32> to vector<1x64xf32>
    %c1_15 = arith.constant 1 : index
    %c0_16 = arith.constant 0 : index
    %c0_17 = arith.constant 0 : index
    %24 = vector.load %arg6[%c1_15, %c0_16, %c0_17] : memref<4x4x64xf32, #tpu.memory_space<vmem>>, vector<1x4x64xf32>
    %25 = vector.shape_cast %24 : vector<1x4x64xf32> to vector<4x64xf32>
    %26 = vector.broadcast %23 : vector<1x64xf32> to vector<4x64xf32>
    %27 = arith.mulf %26, %25 : vector<4x64xf32>
    %28 = arith.addf %22, %27 : vector<4x64xf32>
    %29 = vector.extract_strided_slice %3 {offsets = [2, 0], sizes = [1, 64], strides = [1, 1]} : vector<4x64xf32> to vector<1x64xf32>
    %c2 = arith.constant 2 : index
    %c0_18 = arith.constant 0 : index
    %c0_19 = arith.constant 0 : index
    %30 = vector.load %arg5[%c2, %c0_18, %c0_19] : memref<4x4x64xf32, #tpu.memory_space<vmem>>, vector<1x4x64xf32>
    %31 = vector.shape_cast %30 : vector<1x4x64xf32> to vector<4x64xf32>
    %32 = vector.broadcast %29 : vector<1x64xf32> to vector<4x64xf32>
    %33 = arith.mulf %32, %31 : vector<4x64xf32>
    %34 = arith.addf %28, %33 : vector<4x64xf32>
    %35 = vector.extract_strided_slice %5 {offsets = [2, 0], sizes = [1, 64], strides = [1, 1]} : vector<4x64xf32> to vector<1x64xf32>
    %c2_20 = arith.constant 2 : index
    %c0_21 = arith.constant 0 : index
    %c0_22 = arith.constant 0 : index
    %36 = vector.load %arg6[%c2_20, %c0_21, %c0_22] : memref<4x4x64xf32, #tpu.memory_space<vmem>>, vector<1x4x64xf32>
    %37 = vector.shape_cast %36 : vector<1x4x64xf32> to vector<4x64xf32>
    %38 = vector.broadcast %35 : vector<1x64xf32> to vector<4x64xf32>
    %39 = arith.mulf %38, %37 : vector<4x64xf32>
    %40 = arith.addf %34, %39 : vector<4x64xf32>
    %41 = vector.extract_strided_slice %3 {offsets = [3, 0], sizes = [1, 64], strides = [1, 1]} : vector<4x64xf32> to vector<1x64xf32>
    %c3 = arith.constant 3 : index
    %c0_23 = arith.constant 0 : index
    %c0_24 = arith.constant 0 : index
    %42 = vector.load %arg5[%c3, %c0_23, %c0_24] : memref<4x4x64xf32, #tpu.memory_space<vmem>>, vector<1x4x64xf32>
    %43 = vector.shape_cast %42 : vector<1x4x64xf32> to vector<4x64xf32>
    %44 = vector.broadcast %41 : vector<1x64xf32> to vector<4x64xf32>
    %45 = arith.mulf %44, %43 : vector<4x64xf32>
    %46 = arith.addf %40, %45 : vector<4x64xf32>
    %47 = vector.extract_strided_slice %5 {offsets = [3, 0], sizes = [1, 64], strides = [1, 1]} : vector<4x64xf32> to vector<1x64xf32>
    %c3_25 = arith.constant 3 : index
    %c0_26 = arith.constant 0 : index
    %c0_27 = arith.constant 0 : index
    %48 = vector.load %arg6[%c3_25, %c0_26, %c0_27] : memref<4x4x64xf32, #tpu.memory_space<vmem>>, vector<1x4x64xf32>
    %49 = vector.shape_cast %48 : vector<1x4x64xf32> to vector<4x64xf32>
    %50 = vector.broadcast %47 : vector<1x64xf32> to vector<4x64xf32>
    %51 = arith.mulf %50, %49 : vector<4x64xf32>
    %52 = arith.addf %46, %51 : vector<4x64xf32>
    %c0_28 = arith.constant 0 : index
    %c0_29 = arith.constant 0 : index
    %53 = vector.load %arg4[%c0_28, %c0_29] : memref<64x256xf32, #tpu.memory_space<vmem>>, vector<64x256xf32>
    %cst_30 = arith.constant dense<0.000000e+00> : vector<4x256xf32>
    %54 = tpu.matmul %52, %53, %cst_30 {dimension_numbers = #tpu.dot_dimension_numbers<[1], [0], [0], [1], [0, 0, 1, 1], [], []>, precision = #tpu.contract_precision<fp32>} : vector<4x64xf32>, vector<64x256xf32>, vector<4x256xf32> -> vector<4x256xf32>
    %c0_31 = arith.constant 0 : index
    %c0_32 = arith.constant 0 : index
    %55 = vector.load %arg7[%c0_31, %c0_32] : memref<4x4xf32, #tpu.memory_space<vmem>>, vector<4x4xf32>
    %cst_33 = arith.constant dense<0.000000e+00> : vector<4x256xf32>
    %56 = tpu.matmul %55, %1, %cst_33 {dimension_numbers = #tpu.dot_dimension_numbers<[1], [0], [0], [1], [0, 0, 1, 1], [], []>, precision = #tpu.contract_precision<fp32>} : vector<4x4xf32>, vector<4x256xf32>, vector<4x256xf32> -> vector<4x256xf32>
    %c0_34 = arith.constant 0 : index
    %c0_35 = arith.constant 0 : index
    %57 = vector.load %arg8[%c0_34, %c0_35] : memref<4x1xf32, #tpu.memory_space<vmem>>, vector<4x1xf32>
    %58 = vector.broadcast %57 : vector<4x1xf32> to vector<4x256xf32>
    %59 = arith.addf %56, %58 : vector<4x256xf32>
    %60 = arith.addf %54, %59 : vector<4x256xf32>
    %cst_36 = arith.constant 5.000000e-01 : f32
    %61 = vector.broadcast %cst_36 : f32 to vector<4x256xf32>
    %62 = arith.mulf %61, %60 : vector<4x256xf32>
    %cst_37 = arith.constant 0.707106769 : f32
    %63 = vector.broadcast %cst_37 : f32 to vector<4x256xf32>
    %64 = arith.mulf %60, %63 : vector<4x256xf32>
    %65 = math.absf %64 : vector<4x256xf32>
    %cst_38 = arith.constant 0.327591091 : f32
    %66 = vector.broadcast %cst_38 : f32 to vector<4x256xf32>
    %67 = arith.mulf %66, %65 : vector<4x256xf32>
    %cst_39 = arith.constant 1.000000e+00 : f32
    %68 = vector.broadcast %cst_39 : f32 to vector<4x256xf32>
    %69 = arith.addf %68, %67 : vector<4x256xf32>
    %cst_40 = arith.constant 1.000000e+00 : f32
    %70 = vector.broadcast %cst_40 : f32 to vector<4x256xf32>
    %71 = arith.divf %70, %69 : vector<4x256xf32>
    %cst_41 = arith.constant 1.06140542 : f32
    %72 = vector.broadcast %cst_41 : f32 to vector<4x256xf32>
    %73 = arith.mulf %72, %71 : vector<4x256xf32>
    %cst_42 = arith.constant -1.45315206 : f32
    %74 = vector.broadcast %cst_42 : f32 to vector<4x256xf32>
    %75 = arith.addf %73, %74 : vector<4x256xf32>
    %76 = arith.mulf %75, %71 : vector<4x256xf32>
    %cst_43 = arith.constant 1.42141378 : f32
    %77 = vector.broadcast %cst_43 : f32 to vector<4x256xf32>
    %78 = arith.addf %76, %77 : vector<4x256xf32>
    %79 = arith.mulf %78, %71 : vector<4x256xf32>
    %cst_44 = arith.constant -0.284496725 : f32
    %80 = vector.broadcast %cst_44 : f32 to vector<4x256xf32>
    %81 = arith.addf %79, %80 : vector<4x256xf32>
    %82 = arith.mulf %81, %71 : vector<4x256xf32>
    %cst_45 = arith.constant 0.254829586 : f32
    %83 = vector.broadcast %cst_45 : f32 to vector<4x256xf32>
    %84 = arith.addf %82, %83 : vector<4x256xf32>
    %85 = arith.mulf %84, %71 : vector<4x256xf32>
    %cst_46 = arith.constant 0.000000e+00 : f32
    %86 = vector.broadcast %cst_46 : f32 to vector<4x256xf32>
    %87 = arith.subf %86, %65 : vector<4x256xf32>
    %88 = arith.mulf %87, %65 : vector<4x256xf32>
    %89 = math.exp %88 : vector<4x256xf32>
    %90 = arith.mulf %85, %89 : vector<4x256xf32>
    %cst_47 = arith.constant 1.000000e+00 : f32
    %91 = vector.broadcast %cst_47 : f32 to vector<4x256xf32>
    %92 = arith.subf %91, %90 : vector<4x256xf32>
    %cst_48 = arith.constant 0.000000e+00 : f32
    %93 = vector.broadcast %cst_48 : f32 to vector<4x256xf32>
    %94 = arith.cmpf olt, %64, %93 : vector<4x256xf32>
    %cst_49 = arith.constant 0.000000e+00 : f32
    %95 = vector.broadcast %cst_49 : f32 to vector<4x256xf32>
    %96 = arith.subf %95, %92 : vector<4x256xf32>
    %97 = arith.select %94, %96, %92 : vector<4x256xi1>, vector<4x256xf32>
    %cst_50 = arith.constant 1.000000e+00 : f32
    %98 = vector.broadcast %cst_50 : f32 to vector<4x256xf32>
    %99 = arith.addf %98, %97 : vector<4x256xf32>
    %100 = arith.mulf %62, %99 : vector<4x256xf32>
    %101 = arith.addf %1, %100 : vector<4x256xf32>
    %c0_51 = arith.constant 0 : index
    %c0_52 = arith.constant 0 : index
    %c0_53 = arith.constant 0 : index
    %102 = vector.load %arg9[%c0_51, %c0_52, %c0_53] : memref<1x4x256xf32, #tpu.memory_space<vmem>>, vector<1x4x256xf32>
    %103 = vector.shape_cast %102 : vector<1x4x256xf32> to vector<4x256xf32>
    %104 = vector.shape_cast %101 : vector<4x256xf32> to vector<1x4x256xf32>
    tpu.vector_store %arg9[%c0_51, %c0_52, %c0_53], %104 {strides = array<i32>} : memref<1x4x256xf32, #tpu.memory_space<vmem>>, vector<1x4x256xf32>,
    return
  }
  func.func @transform_0(%arg0: i32) -> (i32, i32, i32) {
    %c0_i32 = arith.constant 0 : i32
    %c0_i32_0 = arith.constant 0 : i32
    %c0_i32_1 = arith.constant 0 : i32
    return %arg0, %c0_i32, %c0_i32_0 : i32, i32, i32
  }
  func.func @transform_1(%arg0: i32) -> (i32, i32) {
    %c0_i32 = arith.constant 0 : i32
    %c0_i32_0 = arith.constant 0 : i32
    %c0_i32_1 = arith.constant 0 : i32
    return %c0_i32, %c0_i32_0 : i32, i32
  }
  func.func @transform_2(%arg0: i32) -> (i32, i32) {
    %c0_i32 = arith.constant 0 : i32
    %c0_i32_0 = arith.constant 0 : i32
    %c0_i32_1 = arith.constant 0 : i32
    return %c0_i32, %c0_i32_0 : i32, i32
  }
  func.func @transform_3(%arg0: i32) -> (i32, i32) {
    %c0_i32 = arith.constant 0 : i32
    %c0_i32_0 = arith.constant 0 : i32
    %c0_i32_1 = arith.constant 0 : i32
    return %c0_i32, %c0_i32_0 : i32, i32
  }
  func.func @transform_4(%arg0: i32) -> (i32, i32, i32) {
    %c0_i32 = arith.constant 0 : i32
    %c0_i32_0 = arith.constant 0 : i32
    %c0_i32_1 = arith.constant 0 : i32
    %c0_i32_2 = arith.constant 0 : i32
    return %c0_i32, %c0_i32_0, %c0_i32_1 : i32, i32, i32
  }
  func.func @transform_5(%arg0: i32) -> (i32, i32, i32) {
    %c0_i32 = arith.constant 0 : i32
    %c0_i32_0 = arith.constant 0 : i32
    %c0_i32_1 = arith.constant 0 : i32
    %c0_i32_2 = arith.constant 0 : i32
    return %c0_i32, %c0_i32_0, %c0_i32_1 : i32, i32, i32
  }
  func.func @transform_6(%arg0: i32) -> (i32, i32) {
    %c0_i32 = arith.constant 0 : i32
    %c0_i32_0 = arith.constant 0 : i32
    %c0_i32_1 = arith.constant 0 : i32
    return %c0_i32, %c0_i32_0 : i32, i32
  }
  func.func @transform_7(%arg0: i32) -> (i32, i32) {
    %c0_i32 = arith.constant 0 : i32
    %c0_i32_0 = arith.constant 0 : i32
    %c0_i32_1 = arith.constant 0 : i32
    return %c0_i32, %c0_i32_0 : i32, i32
  }
  func.func @transform_8(%arg0: i32) -> (i32, i32, i32) {
    %c0_i32 = arith.constant 0 : i32
    %c0_i32_0 = arith.constant 0 : i32
    %c0_i32_1 = arith.constant 0 : i32
    return %arg0, %c0_i32, %c0_i32_0 : i32, i32, i32
  }
}

</mosaic_0001>

<bundles_post_ra>
// kernel: tpu_custom_call.1
= control target key start
LH: loop header
LB: loop body
LE: loop exit
PB: predicated region body
PF: predicated region fallthrough
CT: control target
= control target key end

     0   :  { %13 = vsyncpa [#allocation3], 0  ;;  %s4631_s0 = inlined_call_operand.vmem [shape: f32[2,4,256], index: 0, kind: input, shape index: {}]   ;;  %s4632_s1 = inlined_call_operand.vmem [shape: f32[256,64], index: 1, kind: input, shape index: {}]   ;;  %s4633_s2 = inlined_call_operand.vmem [shape: f32[256,64], index: 2, kind: input, shape index: {}]   ;;  %s4634_s3 = inlined_call_operand.vmem [shape: f32[64,256], index: 3, kind: input, shape index: {}]   ;;  %s4635_s4 = inlined_call_operand.vmem [shape: f32[4,4,64], index: 4, kind: input, shape index: {}]   ;;  %s4636_s5 = inlined_call_operand.vmem [shape: f32[4,4,64], index: 5, kind: input, shape index: {}]   ;;  %s4637_s6 = inlined_call_operand.vmem [shape: f32[4,4], index: 6, kind: input, shape index: {}]   ;;  %s4638_s7 = inlined_call_operand.vmem [shape: f32[4,1], index: 7, kind: input, shape index: {}]   ;;  %s4639_s8 = inlined_call_operand.hbm [shape: f32[2,4,256], index: 8, kind: output, shape index: {}]  }
   0x1   :  { %15 = vsyncpa [#allocation3 + $0x1], 0  ;;  %s2928_s27 = smov 0   ;;  %s2930_s28 = smov 0  }
   0x2   :  { %s2932_s29 = smov 0   ;;  %s2934_s30 = smov 0  }
   0x3 LB: > { %s2949_s9 = sadd.s32 4294967295, %s2880_s30   ;;  %s2749_s10 = sadd.s32 4294967294, %s2880_s30   ;;  %s2880_s30 = sphi %s2934_s30, %s4754_s30   ;;  %s2876_s29 = sphi %s2932_s29, %s4753_s29   ;;  %s2872_s28 = sphi %s2930_s28, %s4752_s28   ;;  %s2868_s27 = sphi %s2928_s27, %s4751_s27  }
   0x4   : > { %s2953_s11 = sadd.s32 1, %s2880_s30   ;;  %s201_s12 = sadd.s32 1, %s2876_s29 }
   0x5   : > { %s198_s13 = ssub.s32 %s2880_s30, %s2953_s11  ;;  %p211_p0 = scmp.ne.s32.totalorder %s2876_s29, %s2872_s28 }
   0x6   : > { %p199_p1 = scmp.eq.s32.totalorder %s198_s13, 0  ;;  %p212_p2 = scmp.eq.s32.totalorder %s2949_s9, 1 }
   0x7   : > { %p217_p3 = scmp.ne.s32.totalorder %s2872_s28, %s2868_s27  ;;  %p218_p4 = scmp.eq.s32.totalorder %s2749_s10, 1 }
   0x8   : > { %s2964_s14 = scalar_select %p199_p1, %s2876_s29, %s201_s12  }
   0x9   : > { %p2966_p5 = por %p212_p2, %p211_p0  ;;  %p2970_p6 = por %p218_p4, %p217_p3 }
   0xa   : > { %p2752_p7 = scmp.ge.s32.totalorder %s2880_s30, 1  ;;  %p265_p8 = scmp.lt.s32.totalorder %s2880_s30, 3 }
   0xc   : > { %p266_p9 = pnand %p2752_p7, %p265_p8 }
   0xe   : > { %269 = sbr.rel (%p266_p9) target bundleno = 605 (0x25d), region = 52 }
  0x13   : > { %v320_v0 = vld [vmem:[%s4632_s1 + $0x78] sm:$0xff]  ;;  %v319_v1 = vld [vmem:[%s4632_s1 + $0x70] sm:$0xff]  ;;  %v318_v2 = vld [vmem:[%s4632_s1 + $0x68] sm:$0xff]  ;;  %p299_p10 = scmp.lt.s32.totalorder %s2949_s9, 1  ;;  %vm1811_vm0 = vcmask 1043456   ;;  %vm1807_vm1 = vcmask 31744  }
  0x14   : > { %v2986_v3 = vand.u32 4294901760, %v320_v0  ;;  %v2988_v4 = vand.u32 4294901760, %v319_v1  ;;  %v2990_v5 = vand.u32 4294901760, %v318_v2  ;;  %v317_v6 = vld [vmem:[%s4632_s1 + $0x60] sm:$0xff]  ;;  %v316_v7 = vld [vmem:[%s4632_s1 + $0x58] sm:$0xff]  ;;  %v315_v8 = vld [vmem:[%s4632_s1 + $0x50] sm:$0xff] }
  0x15   : > { %v3001_v9 = vand.u32 4294901760, %v317_v6  ;;  %v3003_v10 = vand.u32 4294901760, %v316_v7  ;;  %v3005_v11 = vand.u32 4294901760, %v315_v8  ;;  %v314_v12 = vld [vmem:[%s4632_s1 + $0x48] sm:$0xff]  ;;  %v313_v13 = vld [vmem:[%s4632_s1 + $0x40] sm:$0xff]  ;;  %v312_v18 = vld [vmem:[%s4632_s1 + $0x38] sm:$0xff] }
  0x16   : > { %344 = vmatpush.msra.mxu0 %v2986_v3  ;;  %v3015_v14 = vsub.f32 %v320_v0, %v2986_v3  ;;  %v3018_v15 = vsub.f32 %v319_v1, %v2988_v4  ;;  %540 = vmatpush.msra.mxu3 %v2986_v3  ;;  %v3022_v16 = vsub.f32 %v318_v2, %v2990_v5  ;;  %v3024_v17 = vand.u32 4294901760, %v314_v12  ;;  %s3041_s22 = scalar_select %p299_p10, %s2949_s9, 1  ;;  %v311_v26 = vld [vmem:[%s4632_s1 + $0x30] sm:$0xff]  ;;  %v310_v34 = vld [vmem:[%s4632_s1 + $0x28] sm:$0xff]  ;;  %v309_v42 = vld [vmem:[%s4632_s1 + $0x20] sm:$0xff] }
  0x17   : > { %v3030_v19 = vsub.f32 %v317_v6, %v3001_v9  ;;  %v3033_v20 = vsub.f32 %v316_v7, %v3003_v10  ;;  %v3036_v21 = vsub.f32 %v315_v8, %v3005_v11  ;;  %v3048_v25 = vand.u32 4294901760, %v313_v13  ;;  %v308_v48 = vld [vmem:[%s4632_s1 + $0x18] sm:$0xff]  ;;  %v307_v54 = vld [vmem:[%s4632_s1 + $0x10] sm:$0xff]  ;;  %v306_v62 = vld [vmem:[%s4632_s1 + $0x8] sm:$0xff]  ;;  %s296_s20 = sand.u32 1, %s2872_s28  }
  0x18   : > { %346 = vmatpush.msra.mxu0 %v2988_v4  ;;  %487 = vmatpush.msra.mxu2 %v3015_v14  ;;  %v386_v22 = vand.u32 4294901760, %v3015_v14  ;;  %v4654_v23 = vand.u32 4294901760, %v3018_v15  ;;  %v4652_v24 = vand.u32 4294901760, %v3022_v16  ;;  %v3055_v28 = vand.u32 4294901760, %v312_v18  ;;  %s2767_s10 = sshll.u32 %s3041_s22, 3  ;;  %v336_v60 = vld [vmem:[%s4632_s1 + $0xf8] sm:$0xff] }
  0x19   : > { %542 = vmatpush.msra.mxu3 %v2988_v4  ;;  %v4650_v27 = vand.u32 4294901760, %v3030_v19  ;;  %v3058_v29 = vsub.f32 %v314_v12, %v3024_v17  ;;  %v4649_v33 = vand.u32 4294901760, %v3033_v20  ;;  %v3076_v35 = vand.u32 4294901760, %v311_v26  ;;  %s303_s19 = scalar_lea.vmem %s4631_s0, %s2767_s10  ;;  %v305_v6 = vld [vmem:[%s4632_s1] sm:$0xff]  ;;  %v335_v7 = vld [vmem:[%s4632_s1 + $0xf0] sm:$0xff]  ;;  %s2753_s21 = sshll.u32 %s296_s20, 3 }
  0x1a   : > { %348 = vmatpush.msra.mxu0 %v2990_v5  ;;  %490 = vmatpush.msra.mxu2 %v3018_v15  ;;  %v387_v30 = vsub.f32 %v3015_v14, %v386_v22  ;;  %v393_v31 = vsub.f32 %v3018_v15, %v4654_v23  ;;  %v399_v32 = vsub.f32 %v3022_v16, %v4652_v24  ;;  %v4647_v36 = vand.u32 4294901760, %v3036_v21  ;;  %v3128_v55 = vld [vmem:[%s303_s19] sm:$0xff]  ;;  %s2768_s22 = sshll.u32 %s2949_s9, 3  ;;  %s298_s26 = scalar_lea.vmem [#allocation2], %s2753_s21 }
  0x1b   : > { %544 = vmatpush.msra.mxu3 %v2990_v5  ;;  %v405_v39 = vsub.f32 %v3030_v19, %v4650_v27  ;;  %v3086_v40 = vsub.f32 %v313_v13, %v3048_v25  ;;  %v3089_v41 = vand.u32 4294901760, %v310_v34  ;;  %v411_v44 = vsub.f32 %v3033_v20, %v4649_v33  ;;  %4687 = vst [vmem:[#allocation5_spill] sm:$0xff] %v3128_v55  ;;  %s2685_s25 = scalar_lea.hbm %s4639_s8, %s2768_s22  ;;  %s2687_s10 = sshll.u32 %s298_s26, 4  ;;  %s2688_s10 = int_to_ptr.vmem [resolvable:$true] %s2687_s10 }
  0x1c   : > { %350 = vmatpush.msra.mxu0 %v3001_v9  ;;  %v388_v37 = vand.u32 4294901760, %v387_v30  ;;  %493 = vmatpush.msra.mxu2 %v3022_v16  ;;  %v394_v38 = vand.u32 4294901760, %v393_v31  ;;  %v400_v43 = vand.u32 4294901760, %v399_v32  ;;  %v4646_v45 = vand.u32 4294901760, %v3058_v29  ;;  %338 = vst [vmem:[#allocation1] ss:$2 sm:$0xff] %v3128_v55 }
  0x1d   : > { %546 = vmatpush.msra.mxu3 %v3001_v9  ;;  %v3100_v46 = vsub.f32 %v312_v18, %v3055_v28  ;;  %v417_v47 = vsub.f32 %v3036_v21, %v4647_v36  ;;  %v406_v49 = vand.u32 4294901760, %v405_v39  ;;  %v3114_v50 = vand.u32 4294901760, %v309_v42  ;;  %v329_v36 = vld [vmem:[%s4632_s1 + $0xc0] sm:$0xff]  ;;  %s2689_s12 = sshll.u32 %s2685_s25, 4  ;;  %s2674_s9 = scalar_lea.sflag [#allocation3], %s296_s20  ;;  %s2690_s12 = int_to_ptr.hbm [resolvable:$true] %s2689_s12 }
  0x1e   : > { %352 = vmatpush.msra.mxu0 %v3003_v10  ;;  %389 = vmatpush.msra.mxu1 %v388_v37  ;;  %v4645_v51 = vand.u32 4294901760, %v3086_v40  ;;  %v3118_v52 = vsub.f32 %v311_v26, %v3076_v35  ;;  %v3123_v53 = vsub.f32 %v310_v34, %v3089_v41  ;;  %v412_v56 = vand.u32 4294901760, %v411_v44  ;;  %v334_v34 = vld [vmem:[%s4632_s1 + $0xe8] sm:$0xff]  ;;  %s2832_s13 = sshra.s32 %s2690_s12, 4  ;;  %s2838_s21 = scalar_lea.hbm %s4639_s8, 16  ;;  %s2833_s13 = int_to_ptr.hbm [resolvable:$true] %s2832_s13 }
  0x1f   : > { %496 = vmatpush.msra.mxu2 %v3030_v19  ;;  %548 = vmatpush.msra.mxu3 %v3003_v10  ;;  %v423_v57 = vsub.f32 %v3058_v29, %v4646_v45  ;;  %v3134_v58 = vand.u32 4294901760, %v308_v48  ;;  %v4643_v59 = vand.u32 4294901760, %v3100_v46  ;;  %v418_v61 = vand.u32 4294901760, %v417_v47  ;;  %v333_v47 = vld [vmem:[%s4632_s1 + $0xe0] sm:$0xff]  ;;  %s2834_s17 = scalar_lea.hbm %s2833_s13, 8  ;;  %p2839_p0 = scmp.lt.s32.totalorder %s2833_s13, %s4639_s8 }
  0x20   : > { %354 = vmatpush.msra.mxu0 %v3005_v11  ;;  %395 = vmatpush.msra.mxu1 %v394_v38  ;;  %v429_v63 = vsub.f32 %v3086_v40, %v4645_v51  ;;  %v3150_v0 = vand.u32 4294901760, %v307_v54  ;;  %v4642_v1 = vand.u32 4294901760, %v3118_v52  ;;  %v3154_v2 = vsub.f32 %v309_v42, %v3114_v50  ;;  %p2835_p11 = scmp.ne.s32.totalorder %s2833_s13, %s2834_s17  ;;  %p2840_p1 = scmp.lt.s32.totalorder %s2838_s21, %s2834_s17 }
  0x21   : > { %499 = vmatpush.msra.mxu2 %v3033_v20  ;;  %550 = vmatpush.msra.mxu3 %v3005_v11  ;;  %v4641_v8 = vand.u32 4294901760, %v3123_v53  ;;  %v3165_v12 = vand.u32 4294901760, %v336_v60  ;;  %v424_v13 = vand.u32 4294901760, %v423_v57  ;;  %v435_v18 = vsub.f32 %v3100_v46, %v4643_v59 }
  0x22   : > { %356 = vmatpush.msra.mxu0 %v3024_v17  ;;  %401 = vmatpush.msra.mxu1 %v400_v43  ;;  %v3171_v26 = vand.u32 4294901760, %v306_v62  ;;  %v3174_v30 = vsub.f32 %v308_v48, %v3134_v58  ;;  %v3178_v31 = vand.u32 4294901760, %v305_v6  ;;  %v3180_v32 = vand.u32 4294901760, %v335_v7  ;;  %p2836_p12 = pnand %p2835_p11, %p2966_p5  ;;  %p2841_p2 = por %p2840_p1, %p2839_p0 }
  0x23   : > { %502 = vmatpush.msra.mxu2 %v3036_v21  ;;  %552 = vmatpush.msra.mxu3 %v3024_v17  ;;  %v430_v37 = vand.u32 4294901760, %v429_v63  ;;  %v441_v38 = vsub.f32 %v3118_v52, %v4642_v1  ;;  %v4640_v39 = vand.u32 4294901760, %v3154_v2  ;;  %v3191_v42 = vsub.f32 %v307_v54, %v3150_v0  ;;  %v330_v1 = vld [vmem:[%s4632_s1 + $0xc8] sm:$0xff] }
  0x24   : > { %358 = vmatpush.msra.mxu0 %v3048_v25  ;;  %407 = vmatpush.msra.mxu1 %v406_v49  ;;  %4688 = vst [vmem:[#allocation6_spill] sm:$0xff] %v3171_v26  ;;  %v447_v43 = vsub.f32 %v3123_v53, %v4641_v8  ;;  %v3199_v44 = vsub.f32 %v336_v60, %v3165_v12  ;;  %v436_v48 = vand.u32 4294901760, %v435_v18  ;;  %v4644_v49 = vand.u32 4294901760, %v3174_v30  ;;  %p2837_p13 = pneg %p2836_p12 }
  0x25   : > { %505 = vmatpush.msra.mxu2 %v3058_v29  ;;  %554 = vmatpush.msra.mxu3 %v3048_v25  ;;  %4689 = vst [vmem:[#allocation7_spill] sm:$0xff] %v3178_v31  ;;  %v3207_v54 = vsub.f32 %v306_v62, %v3171_v26  ;;  %v3214_v57 = vsub.f32 %v305_v6, %v3178_v31  ;;  %v442_v62 = vand.u32 4294901760, %v441_v38  ;;  %v3227_v18 = vand.u32 4294901760, %v333_v47 }
  0x26   : > { %360 = vmatpush.msra.mxu0 %v3055_v28  ;;  %413 = vmatpush.msra.mxu1 %v412_v56  ;;  %v3209_v56 = vand.u32 4294901760, %v334_v34  ;;  %v3217_v60 = vsub.f32 %v335_v7, %v3180_v32  ;;  %v453_v63 = vsub.f32 %v3154_v2, %v4640_v39  ;;  %v448_v6 = vand.u32 4294901760, %v447_v43  ;;  %p2842_p3 = pnand %p2841_p2, %p2837_p13 }
  0x27   : > { %508 = vmatpush.msra.mxu2 %v3086_v40  ;;  %556 = vmatpush.msra.mxu3 %v3055_v28  ;;  %v4651_v7 = vand.u32 4294901760, %v3199_v44  ;;  %v459_v38 = vsub.f32 %v3174_v30, %v4644_v49  ;;  %v4653_v39 = vand.u32 4294901760, %v3207_v54  ;;  %v3257_v51 = vsub.f32 %v333_v47, %v3227_v18 }
  0x28   : > { %362 = vmatpush.msra.mxu0 %v3076_v35  ;;  %419 = vmatpush.msra.mxu1 %v418_v61  ;;  %v332_v61 = vld [vmem:[%s4632_s1 + $0xd8] sm:$0xff]  ;;  %v3241_v8 = vsub.f32 %v334_v34, %v3209_v56  ;;  %v4655_v59 = vand.u32 4294901760, %v3217_v60  ;;  %v454_v49 = vand.u32 4294901760, %v453_v63  ;;  %v3269_v63 = vand.u32 4294901760, %v330_v1 }
  0x29   : > { %511 = vmatpush.msra.mxu2 %v3100_v46  ;;  %558 = vmatpush.msra.mxu3 %v3076_v35  ;;  %v3243_v43 = vand.u32 4294901760, %v332_v61  ;;  %v460_v47 = vand.u32 4294901760, %v459_v38  ;;  %v3284_v24 = vand.u32 4294901760, %v329_v36  ;;  %vm2108_vm2 = vcmask 523264  }
  0x2a   : > { %364 = vmatpush.msra.mxu0 %v3089_v41  ;;  %425 = vmatpush.msra.mxu1 %v424_v13  ;;  %v4648_v13 = vand.u32 4294901760, %v3191_v42  ;;  %v3301_v33 = vsub.f32 %v330_v1, %v3269_v63  ;;  %v3315_v1 = vld.sshfl [vmem:[#allocation1 + $0x8] sm:$0xff pattern:$0x75316420] }
  0x2b   : > { %514 = vmatpush.msra.mxu2 %v3118_v52  ;;  %560 = vmatpush.msra.mxu3 %v3089_v41  ;;  %v3277_v27 = vsub.f32 %v332_v61, %v3243_v43 }
  0x2c   : > { %366 = vmatpush.msra.mxu0 %v3114_v50  ;;  %431 = vmatpush.msra.mxu1 %v430_v37  ;;  %v331_v37 = vld [vmem:[%s4632_s1 + $0xd0] sm:$0xff]  ;;  %v465_v34 = vsub.f32 %v3191_v42, %v4648_v13  ;;  %v471_v13 = vsub.f32 %v3207_v54, %v4653_v39  ;;  %v4691_v39 = vand.u32 4294901760, %v3018_v15 }
  0x2d   : > { %517 = vmatpush.msra.mxu2 %v3123_v53  ;;  %562 = vmatpush.msra.mxu3 %v3114_v50  ;;  %v3259_v45 = vand.u32 4294901760, %v331_v37 }
  0x2e   : > { %368 = vmatpush.msra.mxu0 %v3134_v58  ;;  %437 = vmatpush.msra.mxu1 %v436_v48  ;;  %v4656_v48 = vand.u32 4294901760, %v3214_v57  ;;  %v466_v38 = vand.u32 4294901760, %v465_v34  ;;  %v3306_v34 = vld.sshfl [vmem:[#allocation1] sm:$0xff pattern:$0x75316420] }
  0x2f   : > { %520 = vmatpush.msra.mxu2 %v3154_v2  ;;  %564 = vmatpush.msra.mxu3 %v3134_v58  ;;  %v3295_v23 = vsub.f32 %v331_v37, %v3259_v45  ;;  %v4690_v37 = vand.u32 4294901760, %v3241_v8  ;;  %1057 = vst [vmem:[#allocation1] ss:$2 sm:$0xff] %v3128_v55 }
  0x30   : > { %370 = vmatpush.msra.mxu0 %v3150_v0  ;;  %443 = vmatpush.msra.mxu1 %v442_v62  ;;  %v728_v62 = vsub.f32 %v3199_v44, %v4651_v7  ;;  %v734_v7 = vsub.f32 %v3217_v60, %v4655_v59  ;;  %v477_v61 = vsub.f32 %v3214_v57, %v4656_v48  ;;  %v472_v48 = vand.u32 4294901760, %v471_v13 }
  0x31   : > { %523 = vmatpush.msra.mxu2 %v3174_v30  ;;  %566 = vmatpush.msra.mxu3 %v3150_v0  ;;  %v740_v14 = vsub.f32 %v3241_v8, %v4690_v37  ;;  %v3321_v13 = vsub.f32 %v329_v36, %v3284_v24  ;;  %v4693_v36 = vand.u32 4294901760, %v3022_v16 }
  0x32   : > { %372 = vmatpush.msra.mxu0 %v3171_v26  ;;  %449 = vmatpush.msra.mxu1 %v448_v6  ;;  %v328_v6 = vld [vmem:[%s4632_s1 + $0xb8] sm:$0xff]  ;;  %v729_v59 = vand.u32 4294901760, %v728_v62  ;;  %v478_v37 = vand.u32 4294901760, %v477_v61 }
  0x33   : > { %526 = vmatpush.msra.mxu2 %v3191_v42  ;;  %568 = vmatpush.msra.mxu3 %v3171_v26  ;;  %v3313_v62 = vand.u32 4294901760, %v328_v6  ;;  %v735_v26 = vand.u32 4294901760, %v734_v7  ;;  %v741_v61 = vand.u32 4294901760, %v740_v14 }
  0x34   : > { %374 = vmatpush.msra.mxu0 %v3178_v31  ;;  %455 = vmatpush.msra.mxu1 %v454_v49  ;;  %v327_v49 = vld [vmem:[%s4632_s1 + $0xb0] sm:$0xff] }
  0x35   : > { %529 = vmatpush.msra.mxu2 %v3207_v54  ;;  %570 = vmatpush.msra.mxu3 %v3178_v31  ;;  %v3332_v7 = vand.u32 4294901760, %v327_v49  ;;  %v3345_v55 = vsub.f32 %v328_v6, %v3313_v62 }
  0x36   : > { %581 = vmatpush.msrb.mxu0 %v386_v22  ;;  %461 = vmatpush.msra.mxu1 %v460_v47  ;;  %v326_v47 = vld [vmem:[%s4632_s1 + $0xa8] sm:$0xff]  ;;  %v4692_v22 = vand.u32 4294901760, %v3257_v51 }
  0x37   : > { %532 = vmatpush.msra.mxu2 %v3214_v57  ;;  %730 = vmatpush.msrb.mxu3 %v729_v59  ;;  %v3347_v16 = vand.u32 4294901760, %v326_v47  ;;  %v4695_v59 = vand.u32 4294901760, %v3030_v19  ;;  %v3360_v31 = vsub.f32 %v327_v49, %v3332_v7 }
  0x38   : > { %585 = vmatpush.msrb.mxu0 %v4691_v39  ;;  %467 = vmatpush.msra.mxu1 %v466_v38  ;;  %v746_v15 = vsub.f32 %v3257_v51, %v4692_v22  ;;  %v325_v38 = vld [vmem:[%s4632_s1 + $0xa0] sm:$0xff]  ;;  %v4694_v22 = vand.u32 4294901760, %v3277_v27 }
  0x39   : > { %685 = vmatpush.msrb.mxu2 %v3165_v12  ;;  %736 = vmatpush.msrb.mxu3 %v735_v26  ;;  %v3362_v19 = vand.u32 4294901760, %v325_v38  ;;  %v4697_v26 = vand.u32 4294901760, %v3033_v20  ;;  %v3373_v49 = vsub.f32 %v326_v47, %v3347_v16  ;;  %v4699_v20 = vand.u32 4294901760, %v3036_v21 }
  0x3a   : > { %589 = vmatpush.msrb.mxu0 %v4693_v36  ;;  %473 = vmatpush.msra.mxu1 %v472_v48  ;;  %v752_v39 = vsub.f32 %v3277_v27, %v4694_v22  ;;  %v324_v48 = vld [vmem:[%s4632_s1 + $0x98] sm:$0xff]  ;;  %v747_v14 = vand.u32 4294901760, %v746_v15  ;;  %v4696_v22 = vand.u32 4294901760, %v3295_v23  ;;  %v3392_v21 = vand.u32 4294901760, %v3306_v34 }
  0x3b   : > { %687 = vmatpush.msrb.mxu2 %v3180_v32  ;;  %742 = vmatpush.msrb.mxu3 %v741_v61  ;;  %v3375_v36 = vand.u32 4294901760, %v324_v48  ;;  %v4662_v61 = vand.u32 4294901760, %v3360_v31 }
  0x3c   : > { %593 = vmatpush.msrb.mxu0 %v4695_v59  ;;  %479 = vmatpush.msra.mxu1 %v478_v37  ;;  %v758_v6 = vsub.f32 %v3295_v23, %v4696_v22  ;;  %v4698_v59 = vand.u32 4294901760, %v3301_v33  ;;  %v753_v15 = vand.u32 4294901760, %v752_v39  ;;  %v4661_v22 = vand.u32 4294901760, %v3345_v55  ;;  %v323_v39 = vld [vmem:[%s4632_s1 + $0x90] sm:$0xff] }
  0x3d   : > { %689 = vmatpush.msrb.mxu2 %v3209_v56  ;;  %748 = vmatpush.msrb.mxu3 %v747_v14  ;;  %v787_v14 = vand.u32 4294901760, %v3373_v49 }
  0x3e   : > { %597 = vmatpush.msrb.mxu0 %v4697_v26  ;;  %648 = vmatpush.msrb.mxu1 %v2986_v3  ;;  %v764_v37 = vsub.f32 %v3301_v33, %v4698_v59  ;;  %v4700_v3 = vand.u32 4294901760, %v3321_v13  ;;  %v759_v47 = vand.u32 4294901760, %v758_v6  ;;  %v3389_v59 = vsub.f32 %v325_v38, %v3362_v19 }
  0x3f   : > { %691 = vmatpush.msrb.mxu2 %v3227_v18  ;;  %754 = vmatpush.msrb.mxu3 %v753_v15  ;;  %v776_v38 = vsub.f32 %v3345_v55, %v4661_v22  ;;  %v3405_v6 = vand.u32 4294901760, %v323_v39  ;;  %v782_v15 = vsub.f32 %v3360_v31, %v4662_v61  ;;  %v3420_v22 = vsub.f32 %v3306_v34, %v3392_v21 }
  0x40   : > { %601 = vmatpush.msrb.mxu0 %v4699_v20  ;;  %650 = vmatpush.msrb.mxu1 %v2988_v4  ;;  %v770_v26 = vsub.f32 %v3321_v13, %v4700_v3  ;;  %v4701_v4 = vand.u32 4294901760, %v3058_v29  ;;  %v765_v20 = vand.u32 4294901760, %v764_v37  ;;  %v322_v3 = vld [vmem:[%s4632_s1 + $0x88] sm:$0xff]  ;;  %v3408_v29 = vsub.f32 %v324_v48, %v3375_v36 }
  0x41   : > { %693 = vmatpush.msrb.mxu2 %v3243_v43  ;;  %760 = vmatpush.msrb.mxu3 %v759_v47  ;;  %v3422_v48 = vand.u32 4294901760, %v322_v3  ;;  %v788_v34 = vsub.f32 %v3373_v49, %v787_v14  ;;  %v4704_v61 = vand.u32 4294901760, %v3118_v52  ;;  %v4705_v52 = vand.u32 4294901760, %v3123_v53 }
  0x42   : > { %605 = vmatpush.msrb.mxu0 %v4701_v4  ;;  %652 = vmatpush.msrb.mxu1 %v2990_v5  ;;  %v4702_v5 = vand.u32 4294901760, %v3086_v40  ;;  %v771_v37 = vand.u32 4294901760, %v770_v26  ;;  %v793_v4 = vand.u32 4294901760, %v3389_v59  ;;  %v4703_v40 = vand.u32 4294901760, %v3100_v46 }
  0x43   : > { %695 = vmatpush.msrb.mxu2 %v3259_v45  ;;  %766 = vmatpush.msrb.mxu3 %v765_v20  ;;  %v777_v26 = vand.u32 4294901760, %v776_v38  ;;  %v799_v47 = vand.u32 4294901760, %v3408_v29  ;;  %v377_v38 = vand.u32 4294901760, %v3420_v22 }
  0x44   : > { %609 = vmatpush.msrb.mxu0 %v4702_v5  ;;  %654 = vmatpush.msrb.mxu1 %v3001_v9  ;;  %v321_v9 = vld [vmem:[%s4632_s1 + $0x80] sm:$0xff]  ;;  %v3436_v5 = vsub.f32 %v323_v39, %v3405_v6  ;;  %v794_v20 = vsub.f32 %v3389_v59, %v793_v4  ;;  %v3449_v39 = vsub.f32 %v322_v3, %v3422_v48 }
  0x45   : > { %697 = vmatpush.msrb.mxu2 %v3269_v63  ;;  %v3441_v46 = vand.u32 4294901760, %v321_v9  ;;  %772 = vmatpush.msrb.mxu3 %v771_v37  ;;  %v378_v3 = vsub.f32 %v3420_v22, %v377_v38 }
  0x46   : > { %613 = vmatpush.msrb.mxu0 %v4703_v40  ;;  %656 = vmatpush.msrb.mxu1 %v3003_v10  ;;  %v783_v10 = vand.u32 4294901760, %v782_v15  ;;  %v805_v37 = vand.u32 4294901760, %v3436_v5  ;;  %v4706_v15 = vand.u32 4294901760, %v3154_v2  ;;  %v811_v40 = vand.u32 4294901760, %v3449_v39 }
  0x47   : > { %699 = vmatpush.msrb.mxu2 %v3284_v24  ;;  %778 = vmatpush.msrb.mxu3 %v777_v26  ;;  %v3463_v53 = vsub.f32 %v321_v9, %v3441_v46  ;;  %v3469_v26 = vand.u32 4294901760, %v3315_v1  ;;  %v4708_v9 = vand.u32 4294901760, %v3191_v42  ;;  %v4710_v42 = vand.u32 4294901760, %v3214_v57  ;;  %v4712_v57 = vld [vmem:[#allocation6_spill] sm:$0xff] }
  0x48   : > { %617 = vmatpush.msrb.mxu0 %v4704_v61  ;;  %658 = vmatpush.msrb.mxu1 %v3005_v11  ;;  %v789_v11 = vand.u32 4294901760, %v788_v34  ;;  %v800_v61 = vsub.f32 %v3408_v29, %v799_v47  ;;  %v4707_v34 = vand.u32 4294901760, %v3174_v30  ;;  %v806_v2 = vsub.f32 %v3436_v5, %v805_v37 }
  0x49   : > { %701 = vmatpush.msrb.mxu2 %v3313_v62  ;;  %784 = vmatpush.msrb.mxu3 %v783_v10  ;;  %v817_v10 = vand.u32 4294901760, %v3463_v53  ;;  %v379_v30 = vand.u32 4294901760, %v378_v3 }
  0x4a   : > { %621 = vmatpush.msrb.mxu0 %v4705_v52  ;;  %660 = vmatpush.msrb.mxu1 %v3024_v17  ;;  %v795_v17 = vand.u32 4294901760, %v794_v20  ;;  %v3488_v20 = vsub.f32 %v3315_v1, %v3469_v26  ;;  %v4709_v52 = vand.u32 4294901760, %v3207_v54 }
  0x4b   : > { %703 = vmatpush.msrb.mxu2 %v3332_v7  ;;  %790 = vmatpush.msrb.mxu3 %v789_v11  ;;  %v818_v11 = vsub.f32 %v3463_v53, %v817_v10 }
  0x4c   : > { %625 = vmatpush.msrb.mxu0 %v4706_v15  ;;  %662 = vmatpush.msrb.mxu1 %v3048_v25  ;;  %v801_v25 = vand.u32 4294901760, %v800_v61  ;;  %v718_v1 = vand.u32 4294901760, %v3488_v20  ;;  %v4714_v61 = vld [vmem:[#allocation7_spill] sm:$0xff] }
  0x4d   : > { %705 = vmatpush.msrb.mxu2 %v3347_v16  ;;  %796 = vmatpush.msrb.mxu3 %v795_v17  ;;  %v1031_v17 = vld [vmem:[%s4633_s2 + $0x30] sm:$0xff] }
  0x4e   : > { %629 = vmatpush.msrb.mxu0 %v4707_v34  ;;  %664 = vmatpush.msrb.mxu1 %v3055_v28  ;;  %v812_v28 = vsub.f32 %v3449_v39, %v811_v40 }
  0x4f   : > { %707 = vmatpush.msrb.mxu2 %v3362_v19  ;;  %802 = vmatpush.msrb.mxu3 %v801_v25 }
  0x50   : > { %633 = vmatpush.msrb.mxu0 %v4708_v9  ;;  %666 = vmatpush.msrb.mxu1 %v3076_v35  ;;  %v807_v35 = vand.u32 4294901760, %v806_v2  ;;  %v813_v54 = vand.u32 4294901760, %v812_v28 }
  0x51   : > { %709 = vmatpush.msrb.mxu2 %v3375_v36  ;;  %380 = vmatmul.f32.vlgmr.msra.gmra.mxu0 %v379_v30 }
  0x52   : > { %637 = vmatpush.msrb.mxu0 %v4709_v52  ;;  %668 = vmatpush.msrb.mxu1 %v3089_v41  ;;  %v819_v41 = vand.u32 4294901760, %v818_v11  ;;  %v1029_v52 = vld [vmem:[%s4633_s2 + $0x20] sm:$0xff] }
  0x53   : > { %711 = vmatpush.msrb.mxu2 %v3405_v6  ;;  %808 = vmatpush.msrb.mxu3 %v807_v35 }
  0x54   : > { %641 = vmatpush.msrb.mxu0 %v4710_v42  ;;  %670 = vmatpush.msrb.mxu1 %v3114_v50  ;;  %v719_v50 = vsub.f32 %v3488_v20, %v718_v1 }
  0x55   : > { %713 = vmatpush.msrb.mxu2 %v3422_v48  ;;  %814 = vmatpush.msrb.mxu3 %v813_v54 }
  0x56   : > { %828 = vmatpush.msra.mxu0 %v3199_v44  ;;  %672 = vmatpush.msrb.mxu1 %v3134_v58  ;;  %v4711_v58 = vand.u32 4294901760, %v3199_v44  ;;  %v4715_v44 = vand.u32 4294901760, %v3241_v8 }
  0x57   : > { %535 = vmatmul.f32.vlgmr.msra.gmra.mxu2 %v3420_v22  ;;  %574 = vmatmul.f32.vlgmr.msra.gmra.mxu3 %v377_v38  ;;  %v720_v22 = vand.u32 4294901760, %v719_v50  ;;  %v1032_v38 = vld [vmem:[%s4633_s2 + $0x38] sm:$0xff] }
  0x58   : > { %831 = vmatpush.msra.mxu0 %v3217_v60  ;;  %674 = vmatpush.msrb.mxu1 %v3150_v0  ;;  %v4713_v0 = vand.u32 4294901760, %v3217_v60  ;;  %v4716_v60 = vand.u32 4294901760, %v3257_v51  ;;  %v3680_v25 = vand.u32 4294901760, %v1032_v38 }
  0x59   : > { %715 = vmatpush.msrb.mxu2 %v3441_v46  ;;  %820 = vmatpush.msrb.mxu3 %v819_v41 }
  0x5a   : > { %834 = vmatpush.msra.mxu0 %v3241_v8  ;;  %676 = vmatpush.msrb.mxu1 %v4712_v57  ;;  %v4717_v8 = vand.u32 4294901760, %v3277_v27 }
  0x5b   : > { %922 = vmatpush.msra.mxu2 %v4711_v58  ;;  %481 = vmatmul.f32.vlgmr.msra.gmra.mxu1 %v3392_v21  ;;  %v3729_v58 = vand.u32 4294901760, %v1029_v52 }
  0x5c   : > { %837 = vmatpush.msra.mxu0 %v3257_v51  ;;  %989 = vmatpush.msra.mxu3 %v3165_v12  ;;  %v4718_v51 = vand.u32 4294901760, %v3295_v23 }
  0x5d   : > { %926 = vmatpush.msra.mxu2 %v4713_v0  ;;  %678 = vmatpush.msrb.mxu1 %v4714_v61 }
  0x5e   : > { %840 = vmatpush.msra.mxu0 %v3277_v27  ;;  %991 = vmatpush.msra.mxu3 %v3180_v32  ;;  %v4719_v27 = vand.u32 4294901760, %v3301_v33 }
  0x5f   : > { %881 = vmatpush.msra.mxu1 %v3165_v12  ;;  %930 = vmatpush.msra.mxu2 %v4715_v44  ;;  %v4720_v12 = vand.u32 4294901760, %v3321_v13 }
  0x60   : > { %721 = vmatmul.f32.vlgmr.msrb.gmra.mxu2 %v720_v22  ;;  %843 = vmatpush.msra.mxu0 %v3295_v23  ;;  %v1040_v23 = vld [vmem:[%s4633_s2 + $0x78] sm:$0xff]  ;;  %v1027_v22 = vld [vmem:[%s4633_s2 + $0x10] sm:$0xff] }
  0x61   : > { %883 = vmatpush.msra.mxu1 %v3180_v32  ;;  %934 = vmatpush.msra.mxu2 %v4716_v60  ;;  %v4722_v32 = vand.u32 4294901760, %v3360_v31 }
  0x62   : > { %993 = vmatpush.msra.mxu3 %v3209_v56  ;;  %643 = vmatmul.f32.vlgmr.msrb.gmra.mxu0 %v3392_v21 }
  0x63   : > { %822 = vmatmul.f32.vlgmr.msrb.gmra.mxu3 %v3469_v26  ;;  %846 = vmatpush.msra.mxu0 %v3301_v33  ;;  %v4721_v33 = vand.u32 4294901760, %v3345_v55 }
  0x64   : > { %885 = vmatpush.msra.mxu1 %v3209_v56  ;;  %938 = vmatpush.msra.mxu2 %v4717_v8  ;;  %v3570_v56 = vand.u32 4294901760, %v1040_v23 }
  0x65   : > { %995 = vmatpush.msra.mxu3 %v3227_v18  ;;  %680 = vmatmul.f32.vlgmr.msrb.gmra.mxu1 %v3392_v21 }
  0x66   : > { %849 = vmatpush.msra.mxu0 %v3321_v13  ;;  %887 = vmatpush.msra.mxu1 %v3227_v18 }
  0x67   : > { %942 = vmatpush.msra.mxu2 %v4718_v51  ;;  %997 = vmatpush.msra.mxu3 %v3243_v43  ;;  %v1026_v51 = vld [vmem:[%s4633_s2 + $0x8] sm:$0xff] }
  0x68   : > { %852 = vmatpush.msra.mxu0 %v3345_v55  ;;  %889 = vmatpush.msra.mxu1 %v3243_v43  ;;  %v1038_v55 = vld [vmem:[%s4633_s2 + $0x68] sm:$0xff]  ;;  %v3593_v43 = vsub.f32 %v1040_v23, %v3570_v56 }
  0x69   : > { %946 = vmatpush.msra.mxu2 %v4719_v27  ;;  %999 = vmatpush.msra.mxu3 %v3259_v45  ;;  %v3590_v18 = vand.u32 4294901760, %v1038_v55  ;;  %v1056_v27 = vld [vmem:[%s4633_s2 + $0xf8] sm:$0xff] }
  0x6a   : > { %855 = vmatpush.msra.mxu0 %v3360_v31  ;;  %891 = vmatpush.msra.mxu1 %v3259_v45  ;;  %v1039_v45 = vld [vmem:[%s4633_s2 + $0x70] sm:$0xff]  ;;  %v1037_v31 = vld [vmem:[%s4633_s2 + $0x60] sm:$0xff] }
  0x6b   : > { %950 = vmatpush.msra.mxu2 %v4720_v12  ;;  %1001 = vmatpush.msra.mxu3 %v3269_v63 }
  0x6c   : > { %858 = vmatpush.msra.mxu0 %v3373_v49  ;;  %893 = vmatpush.msra.mxu1 %v3269_v63  ;;  %v1036_v63 = vld [vmem:[%s4633_s2 + $0x58] sm:$0xff]  ;;  %v1105_v49 = vand.u32 4294901760, %v3593_v43 }
  0x6d   : > { %954 = vmatpush.msra.mxu2 %v4721_v33  ;;  %1003 = vmatpush.msra.mxu3 %v3284_v24 }
  0x6e   : > { %861 = vmatpush.msra.mxu0 %v3389_v59  ;;  %895 = vmatpush.msra.mxu1 %v3284_v24  ;;  %v3580_v24 = vand.u32 4294901760, %v1039_v45  ;;  %v3620_v59 = vsub.f32 %v1038_v55, %v3590_v18  ;;  %v3767_v55 = vand.u32 4294901760, %v1026_v51 }
  0x6f   : > { %958 = vmatpush.msra.mxu2 %v4722_v32  ;;  %1005 = vmatpush.msra.mxu3 %v3313_v62  ;;  %v3763_v32 = vsub.f32 %v1029_v52, %v3729_v58 }
  0x70   : > { %864 = vmatpush.msra.mxu0 %v3408_v29  ;;  %897 = vmatpush.msra.mxu1 %v3313_v62  ;;  %v3603_v62 = vand.u32 4294901760, %v1037_v31  ;;  %v3606_v13 = vsub.f32 %v1039_v45, %v3580_v24  ;;  %v3760_v45 = vand.u32 4294901760, %v1027_v22 }
  0x71   : > { %962 = vmatpush.msra.mxu2 %v787_v14  ;;  %1007 = vmatpush.msra.mxu3 %v3332_v7 }
  0x72   : > { %867 = vmatpush.msra.mxu0 %v3436_v5  ;;  %899 = vmatpush.msra.mxu1 %v3332_v7  ;;  %v3610_v7 = vand.u32 4294901760, %v1036_v63  ;;  %v1111_v14 = vand.u32 4294901760, %v3606_v13  ;;  %v3634_v29 = vsub.f32 %v1037_v31, %v3603_v62  ;;  %v1025_v31 = vld [vmem:[%s4633_s2] sm:$0xff] }
  0x73   : > { %966 = vmatpush.msra.mxu2 %v793_v4  ;;  %1009 = vmatpush.msra.mxu3 %v3347_v16  ;;  %v1033_v4 = vld [vmem:[%s4633_s2 + $0x40] sm:$0xff] }
  0x74   : > { %870 = vmatpush.msra.mxu0 %v3449_v39  ;;  %901 = vmatpush.msra.mxu1 %v3347_v16  ;;  %v1035_v16 = vld [vmem:[%s4633_s2 + $0x50] sm:$0xff]  ;;  %v1112_v39 = vsub.f32 %v3606_v13, %v1111_v14  ;;  %v4677_v15 = vand.u32 4294901760, %v3634_v29 }
  0x75   : > { %970 = vmatpush.msra.mxu2 %v799_v47  ;;  %1011 = vmatpush.msra.mxu3 %v3362_v19  ;;  %v3630_v21 = vand.u32 4294901760, %v1035_v16  ;;  %v1106_v47 = vsub.f32 %v3593_v43, %v1105_v49 }
  0x76   : > { %873 = vmatpush.msra.mxu0 %v3463_v53  ;;  %903 = vmatpush.msra.mxu1 %v3362_v19  ;;  %v1034_v19 = vld [vmem:[%s4633_s2 + $0x48] sm:$0xff]  ;;  %v1113_v9 = vand.u32 4294901760, %v1112_v39  ;;  %v1055_v39 = vld [vmem:[%s4633_s2 + $0xf0] sm:$0xff] }
  0x77   : > { %974 = vmatpush.msra.mxu2 %v805_v37  ;;  %1013 = vmatpush.msra.mxu3 %v3375_v36  ;;  %v3650_v5 = vand.u32 4294901760, %v1034_v19  ;;  %v3663_v37 = vand.u32 4294901760, %v1033_v4  ;;  %v3667_v53 = vsub.f32 %v1035_v16, %v3630_v21 }
  0x78   : > { %876 = vmatmul.f32.vlgmr.msra.gmra.mxu0 %v3488_v20  ;;  %905 = vmatpush.msra.mxu1 %v3375_v36  ;;  %v3639_v36 = vsub.f32 %v1036_v63, %v3610_v7  ;;  %v3715_v20 = vsub.f32 %v1032_v38, %v3680_v25  ;;  %v3772_v63 = vand.u32 4294901760, %v1056_v27 }
  0x79   : > { %1063 = vmatpush.msrb.mxu0 %v3570_v56  ;;  %978 = vmatpush.msra.mxu2 %v811_v40  ;;  %v1107_v40 = vand.u32 4294901760, %v1106_v47  ;;  %v3683_v2 = vsub.f32 %v1034_v19, %v3650_v5  ;;  %v4673_v30 = vand.u32 4294901760, %v3667_v53  ;;  %v3699_v28 = vsub.f32 %v1033_v4, %v3663_v37 }
  0x7a   : > { %1015 = vmatpush.msra.mxu3 %v3405_v6  ;;  %907 = vmatpush.msra.mxu1 %v3405_v6  ;;  %v1117_v6 = vand.u32 4294901760, %v3620_v59  ;;  %v4675_v3 = vand.u32 4294901760, %v3639_v36  ;;  %v4668_v60 = vand.u32 4294901760, %v3715_v20 }
  0x7b   : > { %1065 = vmatpush.msrb.mxu0 %v3580_v24  ;;  %982 = vmatpush.msra.mxu2 %v817_v10  ;;  %v1124_v10 = vsub.f32 %v3634_v29, %v4677_v15  ;;  %v4672_v11 = vand.u32 4294901760, %v3683_v2  ;;  %v1136_v50 = vsub.f32 %v3667_v53, %v4673_v30  ;;  %v4669_v57 = vand.u32 4294901760, %v3699_v28 }
  0x7c   : > { %1017 = vmatpush.msra.mxu3 %v3422_v48  ;;  %984 = vmatmul.f32.vlgmr.msra.gmra.mxu2 %v3469_v26  ;;  %v1118_v34 = vsub.f32 %v3620_v59, %v1117_v6  ;;  %v1154_v19 = vsub.f32 %v3715_v20, %v4668_v60 }
  0x7d   : > { %1067 = vmatpush.msrb.mxu0 %v3590_v18  ;;  %1206 = vmatpush.msrb.mxu2 %v3593_v43  ;;  %v1125_v41 = vand.u32 4294901760, %v1124_v10  ;;  %v1142_v61 = vsub.f32 %v3683_v2, %v4672_v11  ;;  %v1137_v23 = vand.u32 4294901760, %v1136_v50  ;;  %v1148_v33 = vsub.f32 %v3699_v28, %v4669_v57  ;;  %v1053_v50 = vld [vmem:[%s4633_s2 + $0xe0] sm:$0xff] }
  0x7e   : > { %909 = vmatpush.msra.mxu1 %v3422_v48  ;;  %1019 = vmatpush.msra.mxu3 %v3441_v46  ;;  %v3687_v48 = vand.u32 4294901760, %v1031_v17  ;;  %v1119_v35 = vand.u32 4294901760, %v1118_v34  ;;  %v4663_v34 = vand.u32 4294901760, %v3763_v32  ;;  %v3803_v10 = vsub.f32 %v1056_v27, %v3772_v63 }
  0x7f   : > { %1021 = vmatmul.f32.vlgmr.msra.gmra.mxu3 %v3469_v26  ;;  %1069 = vmatpush.msrb.mxu0 %v3603_v62  ;;  %v1030_v26 = vld [vmem:[%s4633_s2 + $0x28] sm:$0xff]  ;;  %v1143_v16 = vand.u32 4294901760, %v1142_v61  ;;  %v1155_v52 = vand.u32 4294901760, %v1154_v19  ;;  %v3837_v19 = vand.u32 4294901760, %v1053_v50 }
  0x80   : > { %1209 = vmatpush.msrb.mxu2 %v3606_v13  ;;  %1259 = vmatpush.msrb.mxu3 %v3570_v56  ;;  %v3711_v42 = vand.u32 4294901760, %v1030_v26  ;;  %v3720_v54 = vsub.f32 %v1031_v17, %v3687_v48  ;;  %v1149_v17 = vand.u32 4294901760, %v1148_v33  ;;  %v1172_v61 = vsub.f32 %v3763_v32, %v4663_v34  ;;  %v4724_v13 = vld [vmem:[#allocation5_spill] sm:$0xff] }
  0x81   : > { %911 = vmatpush.msra.mxu1 %v3441_v46  ;;  %1071 = vmatpush.msrb.mxu0 %v3610_v7  ;;  %v1130_v46 = vsub.f32 %v3639_v36, %v4675_v3  ;;  %v3919_v3 = vld.sshfl [vmem:[#allocation1 + $0x8] sm:$0xff pattern:$0x75316420] }
  0x82   : > { %915 = vmatmul.f32.vlgmr.msra.gmra.mxu1 %v718_v1  ;;  %1212 = vmatpush.msrb.mxu2 %v3620_v59  ;;  %v1028_v1 = vld [vmem:[%s4633_s2 + $0x18] sm:$0xff]  ;;  %v3745_v8 = vsub.f32 %v1030_v26, %v3711_v42  ;;  %v4666_v12 = vand.u32 4294901760, %v3720_v54  ;;  %v3795_v26 = vsub.f32 %v1027_v22, %v3760_v45 }
  0x83   : > { %1108 = vmatpush.msrb.mxu1 %v1107_v40  ;;  %1261 = vmatpush.msrb.mxu3 %v3580_v24  ;;  %v1131_v0 = vand.u32 4294901760, %v1130_v46  ;;  %v3741_v44 = vand.u32 4294901760, %v1028_v1  ;;  %v3791_v40 = vand.u32 4294901760, %v1025_v31  ;;  %v1054_v46 = vld [vmem:[%s4633_s2 + $0xe8] sm:$0xff]  ;;  %v1052_v22 = vld [vmem:[%s4633_s2 + $0xd8] sm:$0xff] }
  0x84   : > { %1073 = vmatpush.msrb.mxu0 %v3630_v21  ;;  %1215 = vmatpush.msrb.mxu2 %v3634_v29  ;;  %v4665_v4 = vand.u32 4294901760, %v3745_v8  ;;  %v1160_v38 = vsub.f32 %v3720_v54, %v4666_v12  ;;  %v3846_v34 = vand.u32 4294901760, %v1052_v22  ;;  %v3870_v12 = vsub.f32 %v1053_v50, %v3837_v19  ;;  %v1049_v50 = vld [vmem:[%s4633_s2 + $0xc0] sm:$0xff] }
  0x85   : > { %1114 = vmatpush.msrb.mxu1 %v1113_v9  ;;  %1263 = vmatpush.msrb.mxu3 %v3590_v18  ;;  %v3780_v47 = vsub.f32 %v1028_v1, %v3741_v44  ;;  %v3800_v9 = vsub.f32 %v1026_v51, %v3767_v55  ;;  %v4667_v51 = vand.u32 4294901760, %v3795_v26  ;;  %v3829_v27 = vsub.f32 %v1025_v31, %v3791_v40 }
  0x86   : > { %1075 = vmatpush.msrb.mxu0 %v3650_v5  ;;  %1218 = vmatpush.msrb.mxu2 %v3639_v36 }
  0x87   : > { %1120 = vmatpush.msrb.mxu1 %v1119_v35  ;;  %1265 = vmatpush.msrb.mxu3 %v3603_v62  ;;  %v1166_v35 = vsub.f32 %v3745_v8, %v4665_v4  ;;  %v4664_v1 = vand.u32 4294901760, %v3780_v47  ;;  %v4670_v33 = vand.u32 4294901760, %v3800_v9 }
  0x88   : > { %1077 = vmatpush.msrb.mxu0 %v3663_v37  ;;  %1221 = vmatpush.msrb.mxu2 %v3667_v53 }
  0x89   : > { %1126 = vmatpush.msrb.mxu1 %v1125_v41  ;;  %1267 = vmatpush.msrb.mxu3 %v3610_v7  ;;  %v3813_v41 = vand.u32 4294901760, %v1055_v39  ;;  %v1178_v31 = vsub.f32 %v3780_v47, %v4664_v1  ;;  %v1184_v1 = vsub.f32 %v3795_v26, %v4667_v51 }
  0x8a   : > { %1079 = vmatpush.msrb.mxu0 %v3680_v25  ;;  %1224 = vmatpush.msrb.mxu2 %v3683_v2 }
  0x8b   : > { %1132 = vmatpush.msrb.mxu1 %v1131_v0  ;;  %1269 = vmatpush.msrb.mxu3 %v3630_v21  ;;  %4723 = vst [vmem:[#allocation6_spill] sm:$0xff] %v3813_v41  ;;  %v1161_v0 = vand.u32 4294901760, %v1160_v38  ;;  %v1167_v38 = vand.u32 4294901760, %v1166_v35  ;;  %v1173_v35 = vand.u32 4294901760, %v1172_v61  ;;  %v1179_v51 = vand.u32 4294901760, %v1178_v31 }
  0x8c   : > { %1081 = vmatpush.msrb.mxu0 %v3687_v48  ;;  %1227 = vmatpush.msrb.mxu2 %v3699_v28 }
  0x8d   : > { %1138 = vmatpush.msrb.mxu1 %v1137_v23  ;;  %1271 = vmatpush.msrb.mxu3 %v3650_v5  ;;  %v3831_v23 = vand.u32 4294901760, %v1054_v46 }
  0x8e   : > { %1083 = vmatpush.msrb.mxu0 %v3711_v42  ;;  %1230 = vmatpush.msrb.mxu2 %v3715_v20 }
  0x8f   : > { %1144 = vmatpush.msrb.mxu1 %v1143_v16  ;;  %1273 = vmatpush.msrb.mxu3 %v3663_v37  ;;  %v4671_v16 = vand.u32 4294901760, %v3803_v10  ;;  %v3859_v4 = vsub.f32 %v1054_v46, %v3831_v23  ;;  %v1050_v46 = vld [vmem:[%s4633_s2 + $0xc8] sm:$0xff] }
  0x90   : > { %1085 = vmatpush.msrb.mxu0 %v3729_v58  ;;  %1233 = vmatpush.msrb.mxu2 %v3720_v54 }
  0x91   : > { %1150 = vmatpush.msrb.mxu1 %v1149_v17  ;;  %1275 = vmatpush.msrb.mxu3 %v3680_v25  ;;  %v3844_v17 = vsub.f32 %v1055_v39, %v3813_v41  ;;  %v4674_v39 = vand.u32 4294901760, %v3829_v27  ;;  %v1447_v61 = vsub.f32 %v3803_v10, %v4671_v16  ;;  %v4678_v16 = vand.u32 4294901760, %v3859_v4 }
  0x92   : > { %1087 = vmatpush.msrb.mxu0 %v3741_v44  ;;  %1236 = vmatpush.msrb.mxu2 %v3745_v8 }
  0x93   : > { %1156 = vmatpush.msrb.mxu1 %v1155_v52  ;;  %1277 = vmatpush.msrb.mxu3 %v3687_v48  ;;  %v1051_v52 = vld [vmem:[%s4633_s2 + $0xd0] sm:$0xff]  ;;  %v4676_v60 = vand.u32 4294901760, %v3844_v17  ;;  %v1196_v31 = vsub.f32 %v3829_v27, %v4674_v39  ;;  %v1448_v30 = vand.u32 4294901760, %v1447_v61 }
  0x94   : > { %1089 = vmatpush.msrb.mxu0 %v3760_v45  ;;  %1239 = vmatpush.msrb.mxu2 %v3763_v32  ;;  %v3877_v57 = vand.u32 4294901760, %v1051_v52  ;;  %v1047_v61 = vld [vmem:[%s4633_s2 + $0xb0] sm:$0xff] }
  0x95   : > { %1162 = vmatpush.msrb.mxu1 %v1161_v0  ;;  %1279 = vmatpush.msrb.mxu3 %v3711_v42  ;;  %v1190_v0 = vsub.f32 %v3800_v9, %v4670_v33  ;;  %v3880_v33 = vsub.f32 %v1052_v22, %v3846_v34  ;;  %v3892_v22 = vand.u32 4294901760, %v1050_v46  ;;  %v1453_v39 = vsub.f32 %v3844_v17, %v4676_v60 }
  0x96   : > { %1091 = vmatpush.msrb.mxu0 %v3767_v55  ;;  %1242 = vmatpush.msrb.mxu2 %v3780_v47  ;;  %v1459_v60 = vsub.f32 %v3859_v4, %v4678_v16  ;;  %v3945_v59 = vand.u32 4294901760, %v1047_v61 }
  0x97   : > { %1168 = vmatpush.msrb.mxu1 %v1167_v38  ;;  %1281 = vmatpush.msrb.mxu3 %v3729_v58  ;;  %v1185_v38 = vand.u32 4294901760, %v1184_v1  ;;  %v1191_v11 = vand.u32 4294901760, %v1190_v0  ;;  %v1048_v1 = vld [vmem:[%s4633_s2 + $0xb8] sm:$0xff]  ;;  %v3909_v0 = vand.u32 4294901760, %v1049_v50  ;;  %v3926_v43 = vsub.f32 %v1050_v46, %v3892_v22 }
  0x98   : > { %1093 = vmatpush.msrb.mxu0 %v3791_v40  ;;  %1245 = vmatpush.msrb.mxu2 %v3795_v26  ;;  %v3928_v15 = vand.u32 4294901760, %v1048_v1  ;;  %v1454_v46 = vand.u32 4294901760, %v1453_v39  ;;  %v1460_v39 = vand.u32 4294901760, %v1459_v60 }
  0x99   : > { %1174 = vmatpush.msrb.mxu1 %v1173_v35  ;;  %1283 = vmatpush.msrb.mxu3 %v3741_v44  ;;  %v4679_v35 = vand.u32 4294901760, %v3870_v12  ;;  %v3943_v16 = vsub.f32 %v1049_v50, %v3909_v0  ;;  %v4682_v50 = vand.u32 4294901760, %v3926_v43 }
  0x9a   : > { %1300 = vmatpush.msra.mxu0 %v1105_v49  ;;  %1248 = vmatpush.msrb.mxu2 %v3800_v9  ;;  %v3907_v49 = vsub.f32 %v1051_v52, %v3877_v57  ;;  %v1197_v52 = vand.u32 4294901760, %v1196_v31  ;;  %v3958_v31 = vsub.f32 %v1048_v1, %v3928_v15 }
  0x9b   : > { %1180 = vmatpush.msrb.mxu1 %v1179_v51  ;;  %1285 = vmatpush.msrb.mxu3 %v3760_v45  ;;  %v3917_v51 = vld.sshfl [vmem:[#allocation1] sm:$0xff pattern:$0x75316420]  ;;  %v4683_v1 = vand.u32 4294901760, %v3943_v16 }
  0x9c   : > { %1304 = vmatpush.msra.mxu0 %v1111_v14  ;;  %1251 = vmatpush.msrb.mxu2 %v3829_v27  ;;  %1804 = vst [vmem:[#allocation1] ss:$2 sm:$0xff] %v4724_v13  ;;  %v1465_v14 = vsub.f32 %v3870_v12, %v4679_v35  ;;  %v4726_v35 = vand.u32 4294901760, %v3880_v33 }
  0x9d   : > { %1186 = vmatpush.msrb.mxu1 %v1185_v38  ;;  %1287 = vmatpush.msrb.mxu3 %v3767_v55  ;;  %v1046_v38 = vld [vmem:[%s4633_s2 + $0xa8] sm:$0xff] }
  0x9e   : > { %1308 = vmatpush.msra.mxu0 %v1117_v6  ;;  %1404 = vmatpush.msra.mxu2 %v3772_v63  ;;  %v4725_v6 = vand.u32 4294901760, %v3634_v29  ;;  %v1471_v13 = vsub.f32 %v3880_v33, %v4726_v35  ;;  %v3960_v29 = vand.u32 4294901760, %v1046_v38  ;;  %v1466_v35 = vand.u32 4294901760, %v1465_v14 }
  0x9f   : > { %1192 = vmatpush.msrb.mxu1 %v1191_v11  ;;  %1289 = vmatpush.msrb.mxu3 %v3791_v40  ;;  %v1045_v11 = vld [vmem:[%s4633_s2 + $0xa0] sm:$0xff] }
  0xa0   : > { %1312 = vmatpush.msra.mxu0 %v4725_v6  ;;  %1406 = vmatpush.msra.mxu2 %v3813_v41  ;;  %v4727_v6 = vand.u32 4294901760, %v3639_v36  ;;  %v1044_v41 = vld [vmem:[%s4633_s2 + $0x98] sm:$0xff]  ;;  %v3976_v36 = vand.u32 4294901760, %v1045_v11  ;;  %v1472_v14 = vand.u32 4294901760, %v1471_v13  ;;  %v3998_v13 = vand.u32 4294901760, %v3917_v51 }
  0xa1   : > { %1449 = vmatpush.msra.mxu3 %v1448_v30  ;;  %1198 = vmatpush.msrb.mxu1 %v1197_v52  ;;  %v4728_v30 = vand.u32 4294901760, %v3907_v49  ;;  %v3974_v52 = vsub.f32 %v1047_v61, %v3945_v59  ;;  %v3987_v61 = vsub.f32 %v1046_v38, %v3960_v29  ;;  %v1489_v38 = vsub.f32 %v3943_v16, %v4683_v1 }
  0xa2   : > { %1316 = vmatpush.msra.mxu0 %v4727_v6  ;;  %1408 = vmatpush.msra.mxu2 %v3831_v23  ;;  %v1494_v6 = vand.u32 4294901760, %v3958_v31 }
  0xa3   : > { %1367 = vmatpush.msra.mxu1 %v3570_v56  ;;  %1455 = vmatpush.msra.mxu3 %v1454_v46  ;;  %v1477_v60 = vsub.f32 %v3907_v49, %v4728_v30  ;;  %v4729_v56 = vand.u32 4294901760, %v3667_v53  ;;  %v1483_v46 = vsub.f32 %v3926_v43, %v4682_v50  ;;  %v3989_v30 = vand.u32 4294901760, %v1044_v41  ;;  %v1043_v53 = vld [vmem:[%s4633_s2 + $0x90] sm:$0xff] }
  0xa4   : > { %1410 = vmatpush.msra.mxu2 %v3837_v19  ;;  %v4006_v50 = vsub.f32 %v1045_v11, %v3976_v36  ;;  %v1495_v11 = vsub.f32 %v3958_v31, %v1494_v6  ;;  %1200 = vmatmul.f32.vlgmr.msrb.gmra.mxu1 %v3998_v13 }
  0xa5   : > { %1320 = vmatpush.msra.mxu0 %v4729_v56  ;;  %1369 = vmatpush.msra.mxu1 %v3580_v24  ;;  %v4730_v24 = vand.u32 4294901760, %v3683_v2  ;;  %v4684_v56 = vand.u32 4294901760, %v3974_v52  ;;  %v4731_v2 = vand.u32 4294901760, %v3699_v28  ;;  %v4022_v1 = vsub.f32 %v1044_v41, %v3989_v30 }
  0xa6   : > { %1461 = vmatpush.msra.mxu3 %v1460_v39  ;;  %1412 = vmatpush.msra.mxu2 %v3846_v34  ;;  %v1478_v39 = vand.u32 4294901760, %v1477_v60  ;;  %v1484_v60 = vand.u32 4294901760, %v1483_v46  ;;  %v4732_v28 = vand.u32 4294901760, %v3715_v20  ;;  %v1041_v46 = vld [vmem:[%s4633_s2 + $0x80] sm:$0xff]  ;;  %v1490_v41 = vand.u32 4294901760, %v1489_v38 }
  0xa7   : > { %1324 = vmatpush.msra.mxu0 %v4730_v24  ;;  %1371 = vmatpush.msra.mxu1 %v3590_v18  ;;  %v1042_v18 = vld [vmem:[%s4633_s2 + $0x88] sm:$0xff]  ;;  %v1506_v24 = vand.u32 4294901760, %v3987_v61  ;;  %v1501_v20 = vsub.f32 %v3974_v52, %v4684_v56  ;;  %v1518_v38 = vand.u32 4294901760, %v4022_v1  ;;  %v4052_v56 = vand.u32 4294901760, %v1041_v46 }
  0xa8   : > { %1467 = vmatpush.msra.mxu3 %v1466_v35  ;;  %v4014_v35 = vand.u32 4294901760, %v1043_v53  ;;  %1414 = vmatpush.msra.mxu2 %v3877_v57 }
  0xa9   : > { %1328 = vmatpush.msra.mxu0 %v4731_v2  ;;  %1373 = vmatpush.msra.mxu1 %v3603_v62  ;;  %v4029_v62 = vsub.f32 %v3917_v51, %v3998_v13  ;;  %v4733_v2 = vand.u32 4294901760, %v3720_v54  ;;  %v4734_v54 = vand.u32 4294901760, %v3745_v8 }
  0xaa   : > { %1473 = vmatpush.msra.mxu3 %v1472_v14  ;;  %v4031_v14 = vand.u32 4294901760, %v1042_v18  ;;  %1416 = vmatpush.msra.mxu2 %v3892_v22  ;;  %v4045_v51 = vsub.f32 %v1043_v53, %v4014_v35 }
  0xab   : > { %1332 = vmatpush.msra.mxu0 %v4732_v28  ;;  %1375 = vmatpush.msra.mxu1 %v3610_v7  ;;  %v1512_v7 = vand.u32 4294901760, %v4006_v50  ;;  %v1496_v28 = vand.u32 4294901760, %v1495_v11 }
  0xac   : > { %1479 = vmatpush.msra.mxu3 %v1478_v39  ;;  %1418 = vmatpush.msra.mxu2 %v3909_v0  ;;  %v1507_v39 = vsub.f32 %v3987_v61, %v1506_v24  ;;  %v4059_v53 = vsub.f32 %v1042_v18, %v4031_v14  ;;  %v1519_v18 = vsub.f32 %v4022_v1, %v1518_v38 }
  0xad   : > { %1336 = vmatpush.msra.mxu0 %v4733_v2  ;;  %1377 = vmatpush.msra.mxu1 %v3630_v21  ;;  %v1096_v21 = vand.u32 4294901760, %v4029_v62  ;;  %v1513_v11 = vsub.f32 %v4006_v50, %v1512_v7  ;;  %v4735_v2 = vand.u32 4294901760, %v3763_v32 }
  0xae   : > { %1485 = vmatpush.msra.mxu3 %v1484_v60  ;;  %1420 = vmatpush.msra.mxu2 %v3928_v15  ;;  %v1502_v60 = vand.u32 4294901760, %v1501_v20  ;;  %v1508_v8 = vand.u32 4294901760, %v1507_v39  ;;  %v4736_v20 = vand.u32 4294901760, %v3780_v47  ;;  %v1530_v32 = vand.u32 4294901760, %v4059_v53 }
  0xaf   : > { %1340 = vmatpush.msra.mxu0 %v4734_v54  ;;  %1379 = vmatpush.msra.mxu1 %v3650_v5  ;;  %v1524_v5 = vand.u32 4294901760, %v4045_v51  ;;  %v4082_v54 = vand.u32 4294901760, %v3919_v3  ;;  %v4737_v39 = vand.u32 4294901760, %v3795_v26  ;;  %v1520_v47 = vand.u32 4294901760, %v1519_v18 }
  0xb0   : > { %1491 = vmatpush.msra.mxu3 %v1490_v41  ;;  %1422 = vmatpush.msra.mxu2 %v3945_v59  ;;  %v4074_v41 = vsub.f32 %v1041_v46, %v4052_v56 }
  0xb1   : > { %1344 = vmatpush.msra.mxu0 %v4735_v2  ;;  %1381 = vmatpush.msra.mxu1 %v3663_v37  ;;  %v1097_v37 = vsub.f32 %v4029_v62, %v1096_v21  ;;  %v4738_v2 = vand.u32 4294901760, %v3800_v9  ;;  %v4101_v26 = vsub.f32 %v3919_v3, %v4082_v54 }
  0xb2   : > { %1497 = vmatpush.msra.mxu3 %v1496_v28  ;;  %1424 = vmatpush.msra.mxu2 %v3960_v29  ;;  %v1514_v28 = vand.u32 4294901760, %v1513_v11  ;;  %v1536_v46 = vand.u32 4294901760, %v4074_v41  ;;  %v4739_v11 = vand.u32 4294901760, %v3829_v27  ;;  %v4740_v27 = vand.u32 4294901760, %v3803_v10 }
  0xb3   : > { %1348 = vmatpush.msra.mxu0 %v4736_v20  ;;  %1383 = vmatpush.msra.mxu1 %v3680_v25  ;;  %v1525_v25 = vsub.f32 %v4045_v51, %v1524_v5 }
  0xb4   : > { %1503 = vmatpush.msra.mxu3 %v1502_v60  ;;  %1426 = vmatpush.msra.mxu2 %v3976_v36  ;;  %v1098_v60 = vand.u32 4294901760, %v1097_v37  ;;  %v1789_v37 = vld [vmem:[%s4634_s3 + $0x40] sm:$0xff] }
  0xb5   : > { %1352 = vmatpush.msra.mxu0 %v4737_v39  ;;  %1385 = vmatpush.msra.mxu1 %v3687_v48  ;;  %v1531_v48 = vsub.f32 %v4059_v53, %v1530_v32  ;;  %v1526_v9 = vand.u32 4294901760, %v1525_v25 }
  0xb6   : > { %1509 = vmatpush.msra.mxu3 %v1508_v8  ;;  %1428 = vmatpush.msra.mxu2 %v3989_v30  ;;  %v1437_v8 = vand.u32 4294901760, %v4101_v26 }
  0xb7   : > { %1356 = vmatpush.msra.mxu0 %v4738_v2  ;;  %1387 = vmatpush.msra.mxu1 %v3711_v42  ;;  %v1537_v42 = vsub.f32 %v4074_v41, %v1536_v46  ;;  %v1532_v3 = vand.u32 4294901760, %v1531_v48  ;;  %v4277_v2 = vand.u32 4294901760, %v1789_v37 }
  0xb8   : > { %1515 = vmatpush.msra.mxu3 %v1514_v28  ;;  %1430 = vmatpush.msra.mxu2 %v4014_v35 }
  0xb9   : > { %1360 = vmatpush.msra.mxu0 %v4739_v11  ;;  %1389 = vmatpush.msra.mxu1 %v3729_v58  ;;  %v1538_v58 = vand.u32 4294901760, %v1537_v42 }
  0xba   : > { %1521 = vmatpush.msra.mxu3 %v1520_v47  ;;  %1099 = vmatmul.f32.vlgmr.msrb.gmra.mxu0 %v1098_v60  ;;  %v1787_v60 = vld [vmem:[%s4634_s3 + $0x30] sm:$0xff] }
  0xbb   : > { %1391 = vmatpush.msra.mxu1 %v3741_v44  ;;  %1547 = vmatpush.msrb.mxu0 %v3803_v10  ;;  %v1438_v44 = vsub.f32 %v4101_v26, %v1437_v8  ;;  %v4742_v10 = vand.u32 4294901760, %v3859_v4 }
  0xbc   : > { %1432 = vmatpush.msra.mxu2 %v4031_v14  ;;  %1527 = vmatpush.msra.mxu3 %v1526_v9 }
  0xbd   : > { %1254 = vmatmul.f32.vlgmr.msrb.gmra.mxu2 %v4029_v62  ;;  %1550 = vmatpush.msrb.mxu0 %v3844_v17  ;;  %v1439_v62 = vand.u32 4294901760, %v1438_v44  ;;  %v1785_v44 = vld [vmem:[%s4634_s3 + $0x20] sm:$0xff] }
  0xbe   : > { %1393 = vmatpush.msra.mxu1 %v3760_v45  ;;  %1434 = vmatpush.msra.mxu2 %v4052_v56  ;;  %v4741_v45 = vand.u32 4294901760, %v3844_v17  ;;  %v4744_v17 = vand.u32 4294901760, %v3870_v12 }
  0xbf   : > { %1533 = vmatpush.msra.mxu3 %v1532_v3  ;;  %1553 = vmatpush.msrb.mxu0 %v3859_v4  ;;  %v4747_v4 = vand.u32 4294901760, %v3926_v43 }
  0xc0   : > { %1293 = vmatmul.f32.vlgmr.msrb.gmra.mxu3 %v1096_v21  ;;  %1641 = vmatpush.msrb.mxu2 %v4740_v27 }
  0xc1   : > { %1395 = vmatpush.msra.mxu1 %v3767_v55  ;;  %1539 = vmatpush.msra.mxu3 %v1538_v58  ;;  %v4743_v55 = vld [vmem:[#allocation6_spill] sm:$0xff]  ;;  %v4291_v58 = vand.u32 4294901760, %v1787_v60 }
  0xc2   : > { %1556 = vmatpush.msrb.mxu0 %v3870_v12  ;;  %1645 = vmatpush.msrb.mxu2 %v4741_v45  ;;  %v4746_v12 = vand.u32 4294901760, %v3907_v49 }
  0xc3   : > { %1708 = vmatpush.msrb.mxu3 %v3772_v63  ;;  %1397 = vmatpush.msra.mxu1 %v3791_v40  ;;  %v4748_v40 = vand.u32 4294901760, %v3943_v16 }
  0xc4   : > { %1559 = vmatpush.msrb.mxu0 %v3880_v33  ;;  %1649 = vmatpush.msrb.mxu2 %v4742_v10 }
  0xc5   : > { %1600 = vmatpush.msrb.mxu1 %v3772_v63  ;;  %1710 = vmatpush.msrb.mxu3 %v4743_v55  ;;  %v4745_v63 = vand.u32 4294901760, %v3880_v33 }
  0xc6   : > { %1440 = vmatmul.f32.vlgmr.msra.gmra.mxu2 %v1439_v62  ;;  %1562 = vmatpush.msrb.mxu0 %v3907_v49  ;;  %v4297_v62 = vand.u32 4294901760, %v1785_v44 }
  0xc7   : > { %1602 = vmatpush.msrb.mxu1 %v4743_v55  ;;  %1653 = vmatpush.msrb.mxu2 %v4744_v17  ;;  %v4304_v17 = vsub.f32 %v1787_v60, %v4291_v58 }
  0xc8   : > { %1712 = vmatpush.msrb.mxu3 %v3831_v23  ;;  %1362 = vmatmul.f32.vlgmr.msra.gmra.mxu0 %v3998_v13 }
  0xc9   : > { %1541 = vmatmul.f32.vlgmr.msra.gmra.mxu3 %v4082_v54  ;;  %1565 = vmatpush.msrb.mxu0 %v3926_v43 }
  0xca   : > { %1604 = vmatpush.msrb.mxu1 %v3831_v23  ;;  %1657 = vmatpush.msrb.mxu2 %v4745_v63  ;;  %v1805_v23 = vld.sshfl [vmem:[#allocation1] sm:$0xff pattern:$0x75316420]  ;;  %v1783_v63 = vld [vmem:[%s4634_s3 + $0x10] sm:$0xff] }
  0xcb   : > { %1714 = vmatpush.msrb.mxu3 %v3837_v19  ;;  %1399 = vmatmul.f32.vlgmr.msra.gmra.mxu1 %v3998_v13 }
  0xcc   : > { %1568 = vmatpush.msrb.mxu0 %v3943_v16  ;;  %1606 = vmatpush.msrb.mxu1 %v3837_v19  ;;  %v1812_v16 = vsel %vm1811_vm0, %v1805_v23, 0 }
  0xcd   : > { %1661 = vmatpush.msrb.mxu2 %v4746_v12  ;;  %1716 = vmatpush.msrb.mxu3 %v3846_v34  ;;  %v1831_v19 = vand.u32 4294901760, %v1812_v16 }
  0xce   : > { %1571 = vmatpush.msrb.mxu0 %v3958_v31  ;;  %1608 = vmatpush.msrb.mxu1 %v3846_v34  ;;  %v381_v34 = vpop.f32.mrf.mxu0 }
  0xcf   : > { %1665 = vmatpush.msrb.mxu2 %v4747_v4  ;;  %1718 = vmatpush.msrb.mxu3 %v3877_v57  ;;  %v1858_v43 = vsub.f32 %v1812_v16, %v1831_v19  ;;  %v1781_v16 = vld [vmem:[%s4634_s3] sm:$0xff] }
  0xd0   : > { %1574 = vmatpush.msrb.mxu0 %v3974_v52  ;;  %1610 = vmatpush.msrb.mxu1 %v3877_v57  ;;  %v4749_v57 = vand.u32 4294901760, %v3974_v52 }
  0xd1   : > { %1669 = vmatpush.msrb.mxu2 %v4748_v40  ;;  %1720 = vmatpush.msrb.mxu3 %v3892_v22 }
  0xd2   : > { %1577 = vmatpush.msrb.mxu0 %v3987_v61  ;;  %1612 = vmatpush.msrb.mxu1 %v3892_v22  ;;  %v1797_v22 = vld [vmem:[%s4637_s6] sm:$0xf]  ;;  %v1806_v61 = vld.sshfl [vmem:[#allocation1 + $0x8] sm:$0xff pattern:$0x75316420] }
  0xd3   : > { %1673 = vmatpush.msrb.mxu2 %v1494_v6  ;;  %1722 = vmatpush.msrb.mxu3 %v3909_v0  ;;  %v1809_v31 = vsel %vm1807_vm1, %v1797_v22, 0  ;;  %v1814_v13 = vsel %vm1811_vm0, %v1806_v61, 0 }
  0xd4   : > { %1580 = vmatpush.msrb.mxu0 %v4006_v50  ;;  %1614 = vmatpush.msrb.mxu1 %v3909_v0  ;;  %v1859_v0 = vand.u32 4294901760, %v1858_v43 }
  0xd5   : > { %1677 = vmatpush.msrb.mxu2 %v4749_v57  ;;  %1724 = vmatpush.msrb.mxu3 %v3928_v15  ;;  %v4313_v57 = vsub.f32 %v1785_v44, %v4297_v62 }
  0xd6   : > { %1583 = vmatpush.msrb.mxu0 %v4022_v1  ;;  %1616 = vmatpush.msrb.mxu1 %v3928_v15  ;;  %v1860_v50 = vsub.f32 %v1858_v43, %v1859_v0  ;;  %v4223_v1 = vand.u32 4294901760, %v1809_v31 }
  0xd7   : > { %1681 = vmatpush.msrb.mxu2 %v1506_v24  ;;  %1726 = vmatpush.msrb.mxu3 %v3945_v59  ;;  %v1977_v24 = vand.u32 4294901760, %v1814_v13  ;;  %v2185_v22 = vand.u32 4294901760, %v4313_v57 }
  0xd8   : > { %1586 = vmatpush.msrb.mxu0 %v4045_v51  ;;  %1618 = vmatpush.msrb.mxu1 %v3945_v59  ;;  %v482_v15 = vpop.f32.mrf.mxu1  ;;  %v1861_v52 = vand.u32 4294901760, %v1860_v50  ;;  %v1791_v51 = vld [vmem:[%s4634_s3 + $0x50] sm:$0xff] }
  0xd9   : > { %1685 = vmatpush.msrb.mxu2 %v1512_v7  ;;  %1728 = vmatpush.msrb.mxu3 %v3960_v29  ;;  %v4260_v20 = vand.u32 4294901760, %v1791_v51  ;;  %v483_v47 = vadd.f32 %v482_v15, %v381_v34  ;;  %v4315_v15 = vand.u32 4294901760, %v1783_v63 }
  0xda   : > { %1589 = vmatpush.msrb.mxu0 %v4059_v53  ;;  %1620 = vmatpush.msrb.mxu1 %v3960_v29  ;;  %v4211_v33 = vpop.f32.mrf.mxu2  ;;  %v4217_v49 = vpop.f32.mrf.mxu3 }
  0xdb   : > { %1689 = vmatpush.msrb.mxu2 %v1518_v38  ;;  %1730 = vmatpush.msrb.mxu3 %v3976_v36  ;;  %v537_v12 = vadd.f32 %v4211_v33, %v483_v47  ;;  %v2179_v33 = vand.u32 4294901760, %v4304_v17 }
  0xdc   : > { %1592 = vmatpush.msrb.mxu0 %v4074_v41  ;;  %1622 = vmatpush.msrb.mxu1 %v3976_v36  ;;  %v1795_v36 = vld [vmem:[%s4634_s3 + $0x70] sm:$0xff] }
  0xdd   : > { %1693 = vmatpush.msrb.mxu2 %v1524_v5  ;;  %1732 = vmatpush.msrb.mxu3 %v3989_v30  ;;  %v2004_v5 = vsub.f32 %v1814_v13, %v1977_v24  ;;  %v2186_v13 = vsub.f32 %v4313_v57, %v2185_v22 }
  0xde   : > { %1595 = vmatmul.f32.vlgmr.msrb.gmra.mxu0 %v4101_v26  ;;  %1624 = vmatpush.msrb.mxu1 %v3989_v30  ;;  %v4230_v30 = vand.u32 4294901760, %v1795_v36 }
  0xdf   : > { %1697 = vmatpush.msrb.mxu2 %v1530_v32  ;;  %1734 = vmatpush.msrb.mxu3 %v4014_v35  ;;  %v4221_v29 = vpop.f32.mrf.mxu0  ;;  %v2005_v39 = vand.u32 4294901760, %v2004_v5 }
  0xe0   : > { %1626 = vmatpush.msrb.mxu1 %v4014_v35  ;;  %1832 = vmatpush.msra.mxu0 %v1831_v19  ;;  %v4238_v35 = vsub.f32 %v1809_v31, %v4223_v1 }
  0xe1   : > { %1701 = vmatpush.msrb.mxu2 %v1536_v46  ;;  %1736 = vmatpush.msrb.mxu3 %v4031_v14  ;;  %v4275_v46 = vsub.f32 %v1791_v51, %v4260_v20  ;;  %v2006_v9 = vsub.f32 %v2004_v5, %v2005_v39 }
  0xe2   : > { %1703 = vmatmul.f32.vlgmr.msrb.gmra.mxu2 %v4082_v54  ;;  %1628 = vmatpush.msrb.mxu1 %v4031_v14  ;;  %v4219_v59 = vpop.f32.mrf.mxu1  ;;  %v4241_v14 = vsub.f32 %v1795_v36, %v4230_v30  ;;  %v4254_v53 = vand.u32 4294901760, %v4238_v35  ;;  %v576_v36 = vadd.f32 %v4217_v49, %v537_v12  ;;  %v2187_v49 = vand.u32 4294901760, %v2186_v13 }
  0xe3   : > { %1738 = vmatpush.msrb.mxu3 %v4052_v56  ;;  %1885 = vmatpush.msra.mxu2 %v1858_v43  ;;  %v4228_v6 = vpop.f32.mrf.mxu2  ;;  %v2167_v3 = vand.u32 4294901760, %v4275_v46  ;;  %v2007_v27 = vand.u32 4294901760, %v2006_v9  ;;  %v4327_v43 = vsub.f32 %v1783_v63, %v4315_v15  ;;  %v2882_v9 = vmov 0  }
  0xe4   : > { %1740 = vmatmul.f32.vlgmr.msrb.gmra.mxu3 %v4082_v54  ;;  %1630 = vmatpush.msrb.mxu1 %v4052_v56  ;;  %v1793_v56 = vld [vmem:[%s4634_s3 + $0x60] sm:$0xff]  ;;  %v2155_v18 = vand.u32 4294901760, %v4241_v14  ;;  %v1836_v54 = vsub.f32 %v4238_v35, %v4254_v53 }
  0xe5   : > { %1634 = vmatmul.f32.vlgmr.msrb.gmra.mxu1 %v1437_v8  ;;  %1908 = vmatpush.msra.mxu3 %v1831_v19  ;;  %v4243_v7 = vand.u32 4294901760, %v1793_v56  ;;  %v4289_v8 = vsub.f32 %v1789_v37, %v4277_v2  ;;  %v2168_v10 = vsub.f32 %v4275_v46, %v2167_v3 }
  0xe6   : > { %1934 = vmatpush.msrb.mxu0 %v1859_v0  ;;  %1862 = vmatpush.msra.mxu1 %v1861_v52  ;;  %v4248_v38 = vpop.f32.mrf.mxu3  ;;  %v2156_v28 = vsub.f32 %v4241_v14, %v2155_v18  ;;  %v1837_v26 = vand.u32 4294901760, %v1836_v54  ;;  %v4329_v0 = vand.u32 4294901760, %v1781_v16  ;;  %v2180_v52 = vsub.f32 %v4304_v17, %v2179_v33  ;;  %v1796_v54 = vld [vmem:[%s4634_s3 + $0x78] sm:$0xff] }
  0xe7   : > { %v4258_v41 = vsub.f32 %v1793_v56, %v4243_v7  ;;  %1978 = vmatpush.msrb.mxu2 %v1977_v24  ;;  %v2173_v55 = vand.u32 4294901760, %v4289_v8  ;;  %2008 = vmatpush.msrb.mxu3 %v2007_v27  ;;  %v2169_v34 = vand.u32 4294901760, %v2168_v10  ;;  %v2191_v56 = vand.u32 4294901760, %v4327_v43 }
  0xe8   : > { %1956 = vmatpush.msrb.mxu1 %v1831_v19  ;;  %v2157_v11 = vand.u32 4294901760, %v2156_v28  ;;  %1838 = vmatmul.f32.vlgmr.msra.gmra.mxu0 %v1837_v26  ;;  %v2181_v51 = vand.u32 4294901760, %v2180_v52 }
  0xe9   : > { %v2161_v25 = vand.u32 4294901760, %v4258_v41  ;;  %2031 = vmatpush.msra.mxu0 %v2004_v5  ;;  %v2174_v23 = vsub.f32 %v4289_v8, %v2173_v55  ;;  %v2192_v5 = vsub.f32 %v4327_v43, %v2191_v56  ;;  %2809 = vset.pattern.permute.xlu0 %v2882_v9 }
  0xea   : > { %1888 = vmatmul.f32.vlgmr.msra.gmra.mxu2 %v4238_v35 }
  0xeb   : > { %2080 = vmatpush.msra.mxu2 %v2005_v39  ;;  %v2162_v42 = vsub.f32 %v4258_v41, %v2161_v25  ;;  %v2175_v50 = vand.u32 4294901760, %v2174_v23  ;;  %v645_v39 = vadd.f32 %v4221_v29, %v576_v36  ;;  %v1798_v29 = vld [vmem:[%s4638_s7] sm:$0xf] }
  0xec   : > { %1912 = vmatmul.f32.vlgmr.msra.gmra.mxu3 %v4254_v53  ;;  %1801 = vperm.xlu0 %2809, %v1798_v29  }
  0xed   : > { %1864 = vmatmul.f32.vlgmr.msra.gmra.mxu1 %v4223_v1  ;;  %v2163_v45 = vand.u32 4294901760, %v2162_v42  ;;  %2102 = vmatpush.msra.mxu3 %v1977_v24  ;;  %v2193_v42 = vand.u32 4294901760, %v2192_v5 }
  0xee   : > { %2054 = vmatpush.msra.mxu1 %v1977_v24  ;;  %v4343_v24 = vsub.f32 %v1781_v16, %v4329_v0 }
  0xf0   : > { %v2197_v37 = vand.u32 4294901760, %v4343_v24  ;;  %1936 = vmatmul.f32.vlgmr.msrb.gmra.mxu0 %v4223_v1 }
  0xf1   : > { %2121 = vmatpush.msrb.mxu0 %v4230_v30 }
  0xf2   : > { %1984 = vmatmul.f32.vlgmr.msrb.gmra.mxu2 %v1837_v26  ;;  %v2198_v60 = vsub.f32 %v4343_v24, %v2197_v37  ;;  %v4361_v26 = vand.u32 4294901760, %v1796_v54 }
  0xf3   : > { %2216 = vmatpush.msrb.mxu2 %v4241_v14  ;;  %2123 = vmatpush.msrb.mxu0 %v4243_v7 }
  0xf4   : > { %2010 = vmatmul.f32.vlgmr.msrb.gmra.mxu3 %v4223_v1  ;;  %v4374_v27 = vsub.f32 %v1796_v54, %v4361_v26  ;;  %v2199_v63 = vand.u32 4294901760, %v2198_v60 }
  0xf5   : > { %v4265_v32 = vpop.f32.mrf.mxu0  ;;  %1958 = vmatmul.f32.vlgmr.msrb.gmra.mxu1 %v4223_v1  ;;  %2219 = vmatpush.msrb.mxu2 %v4258_v41 }
  0xf6   : > { %2158 = vmatpush.msrb.mxu1 %v2157_v11  ;;  %2253 = vmatpush.msrb.mxu3 %v4230_v30  ;;  %v1794_v11 = vld [vmem:[%s4634_s3 + $0x68] sm:$0xff]  ;;  %v2392_v16 = vand.u32 4294901760, %v4374_v27 }
  0xf7   : > { %2222 = vmatpush.msrb.mxu2 %v4275_v46  ;;  %v4370_v44 = vand.u32 4294901760, %v1794_v11  ;;  %2125 = vmatpush.msrb.mxu0 %v4260_v20 }
  0xf8   : > { %2164 = vmatpush.msrb.mxu1 %v2163_v45  ;;  %2255 = vmatpush.msrb.mxu3 %v4243_v7  ;;  %v1792_v45 = vld [vmem:[%s4634_s3 + $0x58] sm:$0xff] }
  0xf9   : > { %2225 = vmatpush.msrb.mxu2 %v4289_v8  ;;  %v4381_v12 = vand.u32 4294901760, %v1792_v45  ;;  %2127 = vmatpush.msrb.mxu0 %v4277_v2  ;;  %v1747_v8 = vld [vmem:[%s4636_s5] sm:$0xf] }
  0xfa   : > { %2170 = vmatpush.msrb.mxu1 %v2169_v34  ;;  %2257 = vmatpush.msrb.mxu3 %v4260_v20  ;;  %v682_v34 = vadd.f32 %v4219_v59, %v645_v39  ;;  %v1788_v59 = vld [vmem:[%s4634_s3 + $0x38] sm:$0xff] }
  0xfb   : > { %2228 = vmatpush.msrb.mxu2 %v4304_v17  ;;  %v4397_v52 = vsub.f32 %v1792_v45, %v4381_v12  ;;  %v4408_v13 = vand.u32 4294901760, %v1788_v59  ;;  %2034 = vmatmul.f32.vlgmr.msra.gmra.mxu0 %v4238_v35  ;;  %v2756_v17 = vld [vmem:[%s4635_s4 + $0x4] sm:$0xf] }
  0xfc   : > { %2176 = vmatpush.msrb.mxu1 %v2175_v50  ;;  %2259 = vmatpush.msrb.mxu3 %v4277_v2 }
  0xfd   : > { %2231 = vmatpush.msrb.mxu2 %v4313_v57  ;;  %v2404_v54 = vand.u32 4294901760, %v4397_v52  ;;  %2058 = vmatmul.f32.vlgmr.msra.gmra.mxu1 %v4254_v53  ;;  %v4431_v60 = vsub.f32 %v1788_v59, %v4408_v13  ;;  %v1784_v53 = vld [vmem:[%s4634_s3 + $0x18] sm:$0xff] }
  0xfe   : > { %2182 = vmatpush.msrb.mxu1 %v2181_v51  ;;  %2261 = vmatpush.msrb.mxu3 %v4291_v58  ;;  %v4438_v9 = vand.u32 4294901760, %v1784_v53 }
  0xff   : > { %v4250_v21 = vpop.f32.mrf.mxu1  ;;  %v4282_v48 = vpop.f32.mrf.mxu2  ;;  %2082 = vmatmul.f32.vlgmr.msra.gmra.mxu2 %v4223_v1  ;;  %2104 = vmatmul.f32.vlgmr.msra.gmra.mxu3 %v4223_v1  ;;  %v2416_v45 = vand.u32 4294901760, %v4431_v60 }
 0x100   : > { %2188 = vmatpush.msrb.mxu1 %v2187_v49  ;;  %v723_v49 = vadd.f32 %v4228_v6, %v682_v34  ;;  %2234 = vmatpush.msrb.mxu2 %v4327_v43  ;;  %v4458_v34 = vsub.f32 %v1784_v53, %v4438_v9 }
 0x101   : > { %2263 = vmatpush.msrb.mxu3 %v4297_v62  ;;  %2129 = vmatpush.msrb.mxu0 %v4291_v58 }
 0x102   : > { %v4310_v4 = vpop.f32.mrf.mxu3  ;;  %2194 = vmatpush.msrb.mxu1 %v2193_v42  ;;  %2237 = vmatpush.msrb.mxu2 %v4343_v24  ;;  %v824_v1 = vadd.f32 %v4248_v38, %v723_v49  ;;  %v2405_v42 = vsub.f32 %v4397_v52, %v2404_v54  ;;  %v2417_v49 = vsub.f32 %v4431_v60, %v2416_v45  ;;  %v2760_v24 = vld [vmem:[%s4635_s4 + $0xc] sm:$0xf] }
 0x103   : > { %2265 = vmatpush.msrb.mxu3 %v4315_v15  ;;  %2131 = vmatpush.msrb.mxu0 %v4297_v62 }
 0x104   : > { %2200 = vmatpush.msrb.mxu1 %v2199_v63  ;;  %2358 = vmatpush.msra.mxu2 %v4361_v26 }
 0x105   : > { %2267 = vmatpush.msrb.mxu3 %v4329_v0  ;;  %2133 = vmatpush.msrb.mxu0 %v4315_v15 }
 0x106   : > { %2329 = vmatpush.msra.mxu1 %v4230_v30  ;;  %2360 = vmatpush.msra.mxu2 %v4370_v44 }
 0x107   : > { %2135 = vmatpush.msrb.mxu0 %v4329_v0 }
 0x108   : > { %2331 = vmatpush.msra.mxu1 %v4243_v7  ;;  %v878_v7 = vadd.f32 %v4265_v32, %v824_v1  ;;  %2362 = vmatpush.msra.mxu2 %v4381_v12 }
 0x109   : > { %2286 = vmatpush.msra.mxu0 %v2155_v18 }
 0x10a   : > { %2333 = vmatpush.msra.mxu1 %v4260_v20  ;;  %v2406_v20 = vand.u32 4294901760, %v2405_v42 }
 0x10b   : > { %2290 = vmatpush.msra.mxu0 %v2161_v25 }
 0x10c   : > { %2335 = vmatpush.msra.mxu1 %v4277_v2 }
 0x10d   : > { %2294 = vmatpush.msra.mxu0 %v2167_v3 }
 0x10e   : > { %2337 = vmatpush.msra.mxu1 %v4291_v58 }
 0x10f   : > { %2298 = vmatpush.msra.mxu0 %v2173_v55 }
 0x110   : > { %2339 = vmatpush.msra.mxu1 %v4297_v62 }
 0x111   : > { %2302 = vmatpush.msra.mxu0 %v2179_v33 }
 0x112   : > { %2341 = vmatpush.msra.mxu1 %v4315_v15 }
 0x113   : > { %2306 = vmatpush.msra.mxu0 %v2185_v22 }
 0x114   : > { %2343 = vmatpush.msra.mxu1 %v4329_v0 }
 0x115   : > { %2310 = vmatpush.msra.mxu0 %v2191_v56 }
 0x117   : > { %2314 = vmatpush.msra.mxu0 %v2197_v37 }
 0x121   : > { %v1201_v40 = vpop.f32.mrf.mxu1 }
 0x137   : > { %v1100_v19 = vpop.f32.mrf.mxu0 }
 0x138   : > { %v1202_v31 = vadd.f32 %v1201_v40, %v1100_v19  ;;  %v4384_v40 = vsub.f32 %v1794_v11, %v4370_v44  ;;  %v1790_v19 = vld [vmem:[%s4634_s3 + $0x48] sm:$0xff] }
 0x139   : > { %v4394_v50 = vand.u32 4294901760, %v1790_v19 }
 0x13b   : > { %v4411_v51 = vsub.f32 %v1790_v19, %v4394_v50  ;;  %2364 = vmatpush.msra.mxu2 %v4394_v50 }
 0x13d   : > { %2366 = vmatpush.msra.mxu2 %v4408_v13 }
 0x140   : > { %v1255_v61 = vpop.f32.mrf.mxu2 }
 0x141   : > { %v1256_v28 = vadd.f32 %v1255_v61, %v1202_v31  ;;  %v2398_v31 = vand.u32 4294901760, %v4384_v40  ;;  %v2393_v61 = vsub.f32 %v4374_v27, %v2392_v16 }
 0x143   : > { %v1294_v47 = vpop.f32.mrf.mxu3  ;;  %v2399_v39 = vsub.f32 %v4384_v40, %v2398_v31  ;;  %v2394_v11 = vand.u32 4294901760, %v2393_v61  ;;  %v917_v61 = vadd.f32 %v4250_v21, %v878_v7 }
 0x144   : > { %v1295_v10 = vadd.f32 %v1294_v47, %v1256_v28  ;;  %v1786_v28 = vld [vmem:[%s4634_s3 + $0x28] sm:$0xff]  ;;  %v2410_v47 = vand.u32 4294901760, %v4411_v51 }
 0x145   : > { %v1363_v23 = vpop.f32.mrf.mxu0  ;;  %v4425_v6 = vand.u32 4294901760, %v1786_v28  ;;  %v2400_v38 = vand.u32 4294901760, %v2399_v39  ;;  %2395 = vmatpush.msra.mxu3 %v2394_v11  ;;  %v2418_v11 = vand.u32 4294901760, %v2417_v49 }
 0x146   : > { %v1364_v36 = vadd.f32 %v1363_v23, %v1295_v10  ;;  %v1782_v10 = vld [vmem:[%s4634_s3 + $0x8] sm:$0xff]  ;;  %v2411_v23 = vsub.f32 %v4411_v51, %v2410_v47 }
 0x147   : > { %v4441_v30 = vsub.f32 %v1786_v28, %v4425_v6  ;;  %v4455_v63 = vand.u32 4294901760, %v1782_v10  ;;  %2401 = vmatpush.msra.mxu3 %v2400_v38  ;;  %2368 = vmatpush.msra.mxu2 %v4425_v6 }
 0x148   : > { %v1400_v5 = vpop.f32.mrf.mxu1  ;;  %v2412_v21 = vand.u32 4294901760, %v2411_v23  ;;  %v2757_v23 = vld [vmem:[%s4636_s5 + $0x4] sm:$0xf] }
 0x149   : > { %v1401_v35 = vadd.f32 %v1400_v5, %v1364_v36  ;;  %v1441_v29 = vpop.f32.mrf.mxu2  ;;  %v2422_v19 = vand.u32 4294901760, %v4441_v30  ;;  %v4469_v36 = vsub.f32 %v1782_v10, %v4455_v63  ;;  %v2428_v5 = vand.u32 4294901760, %v4458_v34  ;;  %2407 = vmatpush.msra.mxu3 %v2406_v20  ;;  %2370 = vmatpush.msra.mxu2 %v4438_v9  ;;  %v2759_v20 = vld [vmem:[%s4636_s5 + $0x8] sm:$0xf] }
 0x14b   : > { %v1442_v59 = vadd.f32 %v1441_v29, %v1401_v35  ;;  %v2423_v2 = vsub.f32 %v4441_v30, %v2422_v19  ;;  %v2434_v39 = vand.u32 4294901760, %v4469_v36  ;;  %v986_v35 = vadd.f32 %v4282_v48, %v917_v61  ;;  %2413 = vmatpush.msra.mxu3 %v2412_v21  ;;  %2372 = vmatpush.msra.mxu2 %v4455_v63  ;;  %v2758_v61 = vld [vmem:[%s4635_s4 + $0x8] sm:$0xf] }
 0x14c   : > { %v1542_v32 = vpop.f32.mrf.mxu3  ;;  %v2429_v58 = vsub.f32 %v4458_v34, %v2428_v5 }
 0x14d   : > { %v1543_v53 = vadd.f32 %v1542_v32, %v1442_v59  ;;  %v2424_v18 = vand.u32 4294901760, %v2423_v2  ;;  %v2435_v48 = vsub.f32 %v4469_v36, %v2434_v39  ;;  %v1023_v41 = vadd.f32 %v4310_v4, %v986_v35  ;;  %2419 = vmatpush.msra.mxu3 %v2418_v11  ;;  %v1744_v4 = vld [vmem:[%s4635_s4] sm:$0xf]  ;;  %v2761_v35 = vld [vmem:[%s4636_s5 + $0xc] sm:$0xf] }
 0x14e   : > { %v2430_v25 = vand.u32 4294901760, %v2429_v58 }
 0x14f   : > { %2425 = vmatpush.msra.mxu3 %v2424_v18  ;;  %v2436_v42 = vand.u32 4294901760, %v2435_v48  ;;  %v1745_v46 = vperm.slane %v1023_v41, 0  ;;  %v1753_v55 = vperm.slane %v1023_v41, 1  ;;  %v1763_v22 = vperm.slane %v1023_v41, 2 }
 0x151   : > { %2431 = vmatpush.msra.mxu3 %v2430_v25  ;;  %v1746_v33 = vmul.f32 %v1745_v46, %v1744_v4  ;;  %v1754_v57 = vmul.f32 %v2756_v17, %v1753_v55  ;;  %v1764_v49 = vmul.f32 %v2758_v61, %v1763_v22 }
 0x153   : > { %2437 = vmatpush.msra.mxu3 %v2436_v42 }
 0x15b   : > { %v1596_v28 = vpop.f32.mrf.mxu0 }
 0x15c   : > { %v1597_v1 = vadd.f32 %v1596_v28, %v1543_v53  ;;  %v1773_v28 = vperm.slane %v1023_v41, 3 }
 0x15e   : > { %v1774_v11 = vmul.f32 %v2760_v24, %v1773_v28 }
 0x162   : > { %v1635_v14 = vpop.f32.mrf.mxu1 }
 0x163   : > { %v1636_v62 = vadd.f32 %v1635_v14, %v1597_v1 }
 0x165   : > { %v1704_v29 = vpop.f32.mrf.mxu2 }
 0x166   : > { %v1705_v15 = vadd.f32 %v1704_v29, %v1636_v62 }
 0x167   : > { %v1741_v10 = vpop.f32.mrf.mxu3 }
 0x168   : > { %v1742_v3 = vadd.f32 %v1741_v10, %v1705_v15 }
 0x16a   : > { %v1748_v0 = vperm.slane %v1742_v3, 0  ;;  %v1758_v7 = vperm.slane %v1742_v3, 1  ;;  %v1768_v56 = vperm.slane %v1742_v3, 2  ;;  %v1778_v53 = vperm.slane %v1742_v3, 3 }
 0x16c   : > { %v1749_v38 = vmul.f32 %v1748_v0, %v1747_v8  ;;  %v1759_v43 = vmul.f32 %v2757_v23, %v1758_v7  ;;  %v1769_v2 = vmul.f32 %v2759_v20, %v1768_v56  ;;  %v1779_v14 = vmul.f32 %v2761_v35, %v1778_v53 }
 0x16e   : > { %v1750_v59 = vadd.f32 %v1749_v38, %v1746_v33 }
 0x170   : > { %v1755_v32 = vadd.f32 %v1754_v57, %v1750_v59 }
 0x172   : > { %v1760_v21 = vadd.f32 %v1759_v43, %v1755_v32 }
 0x174   : > { %v1765_v37 = vadd.f32 %v1764_v49, %v1760_v21 }
 0x176   : > { %v1770_v58 = vadd.f32 %v1769_v2, %v1765_v37 }
 0x178   : > { %v1775_v1 = vadd.f32 %v1774_v11, %v1770_v58 }
 0x17a   : > { %v1780_v18 = vadd.f32 %v1779_v14, %v1775_v1 }
 0x17c   : > { %v2110_v48 = vsel %vm2108_vm2, %v1780_v18, 0 }
 0x17d   : > { %v2136_v62 = vand.u32 4294901760, %v2110_v48 }
 0x17f   : > { %2202 = vmatmul.f32.vlgmr.msrb.gmra.mxu1 %v2136_v62  ;;  %v2137_v41 = vsub.f32 %v2110_v48, %v2136_v62 }
 0x180   : > { %2490 = vmatpush.msrb.mxu1 %v4361_v26 }
 0x181   : > { %2240 = vmatmul.f32.vlgmr.msrb.gmra.mxu2 %v2137_v41  ;;  %v2138_v25 = vand.u32 4294901760, %v2137_v41 }
 0x182   : > { %2492 = vmatpush.msrb.mxu1 %v4370_v44  ;;  %2523 = vmatpush.msrb.mxu2 %v2392_v16 }
 0x183   : > { %2271 = vmatmul.f32.vlgmr.msrb.gmra.mxu3 %v2138_v25  ;;  %v2139_v29 = vsub.f32 %v2137_v41, %v2138_v25 }
 0x184   : > { %2494 = vmatpush.msrb.mxu1 %v4381_v12  ;;  %2527 = vmatpush.msrb.mxu2 %v2398_v31 }
 0x185   : > { %2566 = vmatpush.msrb.mxu3 %v4361_v26  ;;  %v2140_v15 = vand.u32 4294901760, %v2139_v29  ;;  %v1865_v26 = vpop.f32.mrf.mxu1 }
 0x186   : > { %2496 = vmatpush.msrb.mxu1 %v4394_v50  ;;  %2531 = vmatpush.msrb.mxu2 %v2404_v54 }
 0x187   : > { %2568 = vmatpush.msrb.mxu3 %v4370_v44  ;;  %2141 = vmatmul.f32.vlgmr.msrb.gmra.mxu0 %v2140_v15  ;;  %v1839_v44 = vpop.f32.mrf.mxu0 }
 0x188   : > { %2345 = vmatmul.f32.vlgmr.msra.gmra.mxu1 %v2136_v62  ;;  %2453 = vmatpush.msrb.mxu0 %v4374_v27  ;;  %v1889_v27 = vpop.f32.mrf.mxu2 }
 0x189   : > { %2498 = vmatpush.msrb.mxu1 %v4408_v13  ;;  %2535 = vmatpush.msrb.mxu2 %v2410_v47 }
 0x18a   : > { %2570 = vmatpush.msrb.mxu3 %v4381_v12  ;;  %2378 = vmatmul.f32.vlgmr.msra.gmra.mxu2 %v2140_v15  ;;  %v1802_v12 = vpop.permute.xlu0 %1801 }
 0x18b   : > { %2456 = vmatpush.msrb.mxu0 %v4384_v40  ;;  %2500 = vmatpush.msrb.mxu1 %v4425_v6  ;;  %v1913_v40 = vpop.f32.mrf.mxu3  ;;  %v1840_v16 = vadd.f32 %v1839_v44, %v1802_v12 }
 0x18c   : > { %2539 = vmatpush.msrb.mxu2 %v2416_v45  ;;  %2572 = vmatpush.msrb.mxu3 %v4394_v50 }
 0x18d   : > { %2439 = vmatmul.f32.vlgmr.msra.gmra.mxu3 %v2136_v62  ;;  %2459 = vmatpush.msrb.mxu0 %v4397_v52  ;;  %v1959_v31 = vpop.f32.mrf.mxu1 }
 0x18e   : > { %2502 = vmatpush.msrb.mxu1 %v4438_v9  ;;  %2543 = vmatpush.msrb.mxu2 %v2422_v19 }
 0x18f   : > { %2574 = vmatpush.msrb.mxu3 %v4408_v13  ;;  %2462 = vmatpush.msrb.mxu0 %v4411_v51  ;;  %v1937_v50 = vpop.f32.mrf.mxu0  ;;  %v1866_v13 = vadd.f32 %v1865_v26, %v1840_v16 }
 0x190   : > { %2504 = vmatpush.msrb.mxu1 %v4455_v63  ;;  %2547 = vmatpush.msrb.mxu2 %v2428_v5  ;;  %v1985_v52 = vpop.f32.mrf.mxu2 }
 0x191   : > { %2576 = vmatpush.msrb.mxu3 %v4425_v6  ;;  %2316 = vmatmul.f32.vlgmr.msra.gmra.mxu0 %v2136_v62  ;;  %v1890_v54 = vadd.f32 %v1889_v27, %v1866_v13  ;;  %v1986_v47 = vadd.f32 %v1985_v52, %v1802_v12 }
 0x192   : > { %2508 = vmatmul.f32.vlgmr.msrb.gmra.mxu1 %v2138_v25  ;;  %2465 = vmatpush.msrb.mxu0 %v4431_v60 }
 0x193   : > { %2551 = vmatpush.msrb.mxu2 %v2434_v39  ;;  %2578 = vmatpush.msrb.mxu3 %v4438_v9  ;;  %v2011_v51 = vpop.f32.mrf.mxu3  ;;  %v1914_v6 = vadd.f32 %v1913_v40, %v1890_v54 }
 0x194   : > { %2553 = vmatmul.f32.vlgmr.msrb.gmra.mxu2 %v2136_v62  ;;  %2468 = vmatpush.msrb.mxu0 %v4441_v30 }
 0x195   : > { %2580 = vmatpush.msrb.mxu3 %v4455_v63  ;;  %v2059_v60 = vpop.f32.mrf.mxu1  ;;  %v1938_v45 = vadd.f32 %v1937_v50, %v1914_v6  ;;  %v2012_v63 = vadd.f32 %v2011_v51, %v1986_v47 }
 0x196   : > { %2582 = vmatmul.f32.vlgmr.msrb.gmra.mxu3 %v2136_v62  ;;  %2471 = vmatpush.msrb.mxu0 %v4458_v34 }
 0x197   : > { %v2035_v9 = vpop.f32.mrf.mxu0  ;;  %v1960_v19 = vadd.f32 %v1959_v31, %v1938_v45 }
 0x198   : > { %2474 = vmatpush.msrb.mxu0 %v4469_v36  ;;  %v2083_v30 = vpop.f32.mrf.mxu2  ;;  %v2036_v36 = vadd.f32 %v2035_v9, %v2012_v63 }
 0x199   : > { %2477 = vmatmul.f32.vlgmr.msrb.gmra.mxu0 %v2137_v41 }
 0x19a   : > { %v2060_v46 = vadd.f32 %v2059_v60, %v2036_v36 }
 0x19b   : > { %v2105_v34 = vpop.f32.mrf.mxu3 }
 0x19c   : > { %v2084_v55 = vadd.f32 %v2083_v30, %v2060_v46 }
 0x19e   : > { %v2106_v7 = vadd.f32 %v2105_v34, %v2084_v55 }
 0x1fc   : > { %v2203_v5 = vpop.f32.mrf.mxu1 }
 0x204   : > { %v2142_v39 = vpop.f32.mrf.mxu0  ;;  %v2241_v42 = vpop.f32.mrf.mxu2 }
 0x205   : > { %v2143_v10 = vadd.f32 %v2142_v39, %v1960_v19  ;;  %v2346_v17 = vpop.f32.mrf.mxu1 }
 0x206   : > { %v2272_v4 = vpop.f32.mrf.mxu3 }
 0x207   : > { %v2204_v3 = vadd.f32 %v2203_v5, %v2143_v10 }
 0x209   : > { %v2242_v8 = vadd.f32 %v2241_v42, %v2204_v3 }
 0x20b   : > { %v2273_v0 = vadd.f32 %v2272_v4, %v2242_v8 }
 0x20d   : > { %v2379_v38 = vpop.f32.mrf.mxu2 }
 0x20e   : > { %v2317_v33 = vpop.f32.mrf.mxu0  ;;  %v2380_v22 = vadd.f32 %v2379_v38, %v2106_v7 }
 0x20f   : > { %v2318_v23 = vadd.f32 %v2317_v33, %v2273_v0  ;;  %v2509_v28 = vpop.f32.mrf.mxu1 }
 0x210   : > { %v2440_v59 = vpop.f32.mrf.mxu3 }
 0x211   : > { %v4581_v57 = vadd.f32 %v2346_v17, %v2318_v23  ;;  %v2441_v43 = vadd.f32 %v2440_v59, %v2380_v22 }
 0x213   : > { %v4584_v61 = vmul.f32 0.70710677, %v4581_v57 }
 0x215   : > { %v2590_v32 = vand.u32 2147483647, %v4584_v61  ;;  %vm2656_vm11 = vcmp.lt.f32.partialorder %v4584_v61, 0.0 }
 0x216   : > { %v2478_v56 = vpop.f32.mrf.mxu0 }
 0x217   : > { %v2592_v20 = vmul.f32 0.3275911, %v2590_v32  ;;  %v2479_v49 = vadd.f32 %v2478_v56, %v2441_v43  ;;  %v2554_v37 = vpop.f32.mrf.mxu2  ;;  %v2644_v52 = vsub.f32 0.0, %v2590_v32 }
 0x219   : > { %v2594_v21 = vadd.f32 1.0, %v2592_v20  ;;  %v2510_v24 = vadd.f32 %v2509_v28, %v2479_v49  ;;  %v2583_v53 = vpop.f32.mrf.mxu3  ;;  %v2646_v9 = vmul.f32 %v2644_v52, %v2590_v32 }
 0x21b   : > { %2810 = vrcp.f32 %v2594_v21  ;;  %v2555_v2 = vadd.f32 %v2554_v37, %v2510_v24  ;;  %v2607_v62 = vand.u32 2147483648, %v2594_v21  ;;  %v2605_v25 = vand.u32 2147483647, %v2594_v21 }
 0x21c   : > { %vm2601_vm4 = vweird.f32 %v2594_v21  ;;  %v2648_v36 = vmul.f32 1.442695, %v2646_v9 }
 0x21d   : > { %v4587_v35 = vadd.f32 %v2583_v53, %v2555_v2  ;;  %v2608_v26 = vor.u32 1.1754944e-38, %v2607_v62  ;;  %vm2606_vm6 = vcmp.eq.f32.partialorder %v2605_v25, 8.507059e+37 }
 0x21f   : > { %v4590_v11 = vmul.f32 0.70710677, %v4587_v35  ;;  %v2587_v2 = vmul.f32 0.5, %v4587_v35 }
 0x221   : > { %v2811_v58 = vpop.eup %2810  ;;  %v2591_v14 = vand.u32 2147483647, %v4590_v11  ;;  %vm2657_vm12 = vcmp.lt.f32.partialorder %v4590_v11, 0.0 }
 0x222   : > { %v2597_v1 = vmul.f32 %v2811_v58, %v2594_v21  ;;  %vm2602_vm3 = vweird.f32 %v2811_v58 }
 0x223   : > { %v2593_v48 = vmul.f32 0.3275911, %v2591_v14  ;;  %vm2603_vm5 = vmor %vm2601_vm4, %vm2602_vm3  ;;  %v2645_v39 = vsub.f32 0.0, %v2591_v14 }
 0x224   : > { %v2598_v18 = vsub.f32 1.0, %v2597_v1 }
 0x225   : > { %v2595_v29 = vadd.f32 1.0, %v2593_v48  ;;  %v2647_v3 = vmul.f32 %v2645_v39, %v2591_v14 }
 0x226   : > { %v2599_v41 = vmul.f32 %v2811_v58, %v2598_v18  ;;  %v4750_v18 = vld [vmem:[#allocation5_spill] sm:$0xff] }
 0x227   : > { %2812 = vrcp.f32 %v2595_v29  ;;  %v2622_v54 = vand.u32 2147483648, %v2595_v29  ;;  %v2620_v47 = vand.u32 2147483647, %v2595_v29  ;;  %vm2616_vm8 = vweird.f32 %v2595_v29 }
 0x228   : > { %v2600_v15 = vadd.f32 %v2811_v58, %v2599_v41  ;;  %2814 = vpow2.f32 %v2648_v36  ;;  %v2650_v0 = vmul.f32 1.442695, %v2647_v3 }
 0x229   : > { %v2623_v63 = vor.u32 1.1754944e-38, %v2622_v54  ;;  %vm2621_vm10 = vcmp.eq.f32.partialorder %v2620_v47, 8.507059e+37 }
 0x22a   : > { %v2604_v44 = vsel %vm2603_vm5, %v2811_v58, %v2600_v15  ;;  %2816 = vpow2.f32 %v2650_v0  ;;  %v2586_v58 = vmul.f32 0.5, %v4581_v57 }
 0x22b   : > { %v2609_v27 = vsel %vm2606_vm6, %v2608_v26, %v2604_v44 }
 0x22c   : > { %v2626_v12 = vmul.f32 1.0614054, %v2609_v27 }
 0x22d   : > { %v2813_v40 = vpop.eup %2812 }
 0x22e   : > { %v2628_v16 = vadd.f32 -1.4531521, %v2626_v12  ;;  %v2612_v31 = vmul.f32 %v2813_v40, %v2595_v29  ;;  %vm2617_vm7 = vweird.f32 %v2813_v40  ;;  %v2815_v33 = vpop.eup %2814 }
 0x22f   : > { %vm2618_vm9 = vmor %vm2616_vm8, %vm2617_vm7 }
 0x230   : > { %v2630_v50 = vmul.f32 %v2628_v16, %v2609_v27  ;;  %v2613_v13 = vsub.f32 1.0, %v2612_v31  ;;  %v2817_v43 = vpop.eup %2816 }
 0x232   : > { %v2632_v51 = vadd.f32 1.4214138, %v2630_v50  ;;  %v2614_v6 = vmul.f32 %v2813_v40, %v2613_v13 }
 0x234   : > { %v2634_v60 = vmul.f32 %v2632_v51, %v2609_v27  ;;  %v2615_v30 = vadd.f32 %v2813_v40, %v2614_v6 }
 0x236   : > { %v2636_v45 = vadd.f32 -0.28449672, %v2634_v60  ;;  %v2619_v34 = vsel %vm2618_vm9, %v2813_v40, %v2615_v30 }
 0x237   : > { %v2624_v5 = vsel %vm2621_vm10, %v2623_v63, %v2619_v34 }
 0x238   : > { %v2638_v19 = vmul.f32 %v2636_v45, %v2609_v27  ;;  %v2627_v42 = vmul.f32 1.0614054, %v2624_v5 }
 0x23a   : > { %v2640_v10 = vadd.f32 0.2548296, %v2638_v19  ;;  %v2629_v46 = vadd.f32 -1.4531521, %v2627_v42 }
 0x23c   : > { %v2631_v4 = vmul.f32 %v2629_v46, %v2624_v5  ;;  %v2642_v8 = vmul.f32 %v2640_v10, %v2609_v27 }
 0x23e   : > { %v2633_v55 = vadd.f32 1.4214138, %v2631_v4  ;;  %v2652_v38 = vmul.f32 %v2815_v33, %v2642_v8 }
 0x240   : > { %v2635_v17 = vmul.f32 %v2633_v55, %v2624_v5  ;;  %v2654_v22 = vsub.f32 1.0, %v2652_v38 }
 0x242   : > { %v2637_v7 = vadd.f32 -0.28449672, %v2635_v17  ;;  %v2658_v56 = vsub.f32 0.0, %v2654_v22 }
 0x244   : > { %v2639_v23 = vmul.f32 %v2637_v7, %v2624_v5  ;;  %v2660_v28 = vsel %vm2656_vm11, %v2658_v56, %v2654_v22 }
 0x245   : > { %v2662_v37 = vadd.f32 1.0, %v2660_v28 }
 0x246   : > { %v2641_v59 = vadd.f32 0.2548296, %v2639_v23 }
 0x247   : > { %v2664_v61 = vmul.f32 %v2662_v37, %v2586_v58 }
 0x248   : > { %v2643_v32 = vmul.f32 %v2641_v59, %v2624_v5 }
 0x24a   : > { %v2653_v20 = vmul.f32 %v2817_v43, %v2643_v32 }
 0x24c   : > { %v2655_v49 = vsub.f32 1.0, %v2653_v20 }
 0x24e   : > { %v2659_v21 = vsub.f32 0.0, %v2655_v49 }
 0x250   : > { %v2661_v24 = vsel %vm2657_vm12, %v2659_v21, %v2655_v49 }
 0x251   : > { %v2663_v53 = vadd.f32 1.0, %v2661_v24 }
 0x253   : > { %v2665_v1 = vmul.f32 %v2663_v53, %v2587_v2 }
 0x255   : > { %v2668_v14 = vrot.slane %v2665_v1, 4 }
 0x257   : > { %v2669_v11 = vsel %vm1811_vm0, %v2664_v61, %v2668_v14 }
 0x258   : > { %v2671_v48 = vadd.f32 %v2669_v11, %v4750_v18 }
 0x25a   : > { %2672 = vst [vmem:[%s298_s26] sm:$0xff] %v2671_v48 }
 0x25b   : > { %2845 = shalt.err (!%p2842_p3)
}
 0x25c   : > { %2769 = dma.vmem_to_hbm [thread:$0]  (%p2966_p5), %s2688_s10, 128, %s2690_s12, %s2674_s9  }
 0x25d PF: > { %p2775_p4 = scmp.ge.s32.totalorder %s2880_s30, 2  ;;  %s2701_s20 = sand.u32 1, %s2868_s27  }
 0x25e   : > { %s2702_s24 = scalar_lea.sflag [#allocation3], %s2701_s20 }
 0x25f   : > { %p2772_p7 = pnand %p2775_p4, %p2970_p6 }
 0x261   : > { %p2773_p8 = pneg %p2772_p7 }
 0x263   : > { %2863 = dma.done.wait (%p2773_p8), %s2702_s24, 128  }
 0x264   : > { %2865 = vsyncadd (%p2773_p8), %s2702_s24, 4294967168  ;;  %p18_p9 = scmp.ge.s32.totalorder %s2953_s11, 4   ;;  %s4751_s27 = smov %s2872_s28 }
 0x265   : > { %s4752_s28 = smov %s2876_s29  ;;  %s4753_s29 = smov %s2964_s14 }
 0x266   : > { %s4754_s30 = smov %s2953_s11  ;;  %20 = sbr.rel (!%p18_p9) target bundleno = 3 (0x3), region = 93 }
 0x26b   :  { %2708 = vsyncpa [#allocation3], 1 }
 0x26c   :  { %2710 = vsyncpa [#allocation3 + $0x1], 1 }

</bundles_post_ra>
